<compile_context>
chip_gen: v7x
topology: tpu7x:2x2x1
jax: 0.10.0
libtpu: 0.0.40
codegen_flags: <defaults>
</compile_context>

<pallas_src>
import functools

import jax
import jax.numpy as jnp
import numpy as np
from jax.experimental import pallas as pl
from jax.experimental.pallas import tpu as pltpu

BF16 = jnp.bfloat16
F32 = jnp.float32
EPS = 1e-5  # PyTorch LayerNorm / TransformerEncoderLayer default


# ----------------------------------------------------------------------------
# In-kernel helpers
# ----------------------------------------------------------------------------
def _mm(a, b):
    """a @ b on the MXU.  `b` must already be bf16; `a` is cast once here."""
    return jax.lax.dot_general(
        a.astype(BF16), b,
        dimension_numbers=(((1,), (0,)), ((), ())),
        preferred_element_type=F32)


def _mm_tb(a, b):
    """a @ b.T on the MXU (both operands already bf16), f32 accumulation."""
    return jax.lax.dot_general(
        a, b,
        dimension_numbers=(((1,), (1,)), ((), ())),
        preferred_element_type=F32)


def _layernorm(x, g, b):
    """PyTorch LayerNorm semantics (biased variance) over the last axis, f32."""
    mu = jnp.mean(x, axis=-1, keepdims=True)
    c = x - mu
    var = jnp.mean(c * c, axis=-1, keepdims=True)
    return c * jax.lax.rsqrt(var + EPS) * g + b


# ----------------------------------------------------------------------------
# Fused forward kernel: one grid step == one batch element
# ----------------------------------------------------------------------------
def _fused_forward_kernel(
    h_ref, feat_w_ref, feat_b_ref,
    in_w_ref, in_b_ref, out_w_ref, out_b_ref,
    ln1_g_ref, ln1_b_ref,
    ff1_w_ref, ff1_b_ref, ff2_w_ref, ff2_b_ref,
    ln2_g_ref, ln2_b_ref,
    dec_w_ref, dec_b_ref, fln_g_ref, fln_b_ref,
    o_ref,
    *, S, nhead, nlayers, nhid):
    dh = nhid // nhead

    # feature Linear on this batch's (S, nfeat) token rows
    x = _mm(h_ref[0], feat_w_ref[...]) + feat_b_ref[...]          # (S, nhid) f32

    # TODO(synk): convert to lax.fori_loop(..., unroll=True) when nlayers grows.
    for l in range(nlayers):
        # ---- fused QKV projection (1/sqrt(dh) folded into Q cols/bias) ------
        qkv = (_mm(x, in_w_ref[l]) + in_b_ref[l]).astype(BF16)    # (S, 3*nhid)

        heads = []
        for hd in range(nhead):
            c = hd * dh
            q = qkv[:, c:c + dh]                                  # (S, dh) bf16
            k = qkv[:, nhid + c:nhid + c + dh]                    # (S, dh) bf16
            v = qkv[:, 2 * nhid + c:2 * nhid + c + dh]            # (S, dh) bf16
            s = _mm_tb(q, k)                                      # (S, S) f32
            s = s - jnp.max(s, axis=-1, keepdims=True)
            p = jnp.exp(s)
            p = p * pl.reciprocal(jnp.sum(p, axis=-1, keepdims=True),
                                  approx=True)
            heads.append(_mm(p, v))                               # (S, dh) f32

        # ---- merge heads (lane concat) + out-projection + residual + LN1 ----
        merged = jnp.concatenate(heads, axis=-1)                  # (S, nhid) f32
        attn = _mm(merged, out_w_ref[l]) + out_b_ref[l]
        x = _layernorm(x + attn, ln1_g_ref[l], ln1_b_ref[l])

        # ---- feed-forward (ReLU, dropout = identity) + residual + LN2 -------
        ff = jnp.maximum(_mm(x, ff1_w_ref[l]) + ff1_b_ref[l], 0.0)
        ff = _mm(ff, ff2_w_ref[l]) + ff2_b_ref[l]
        x = _layernorm(x + ff, ln2_g_ref[l], ln2_b_ref[l])

    # ---- decoder: flatten (S, nhid) lane-wise, ONE K = S*nhid matmul + LN ---
    x_flat = jnp.concatenate([x[s_:s_ + 1, :] for s_ in range(S)],
                             axis=-1)                             # (1, S*nhid)
    out = _mm(x_flat, dec_w_ref[...]) + dec_b_ref[...]            # (1, nout) f32
    o_ref[0] = _layernorm(out, fln_g_ref[...], fln_b_ref[...]).astype(o_ref.dtype)


# ----------------------------------------------------------------------------
# Parameters (deterministic synthetic init, PyTorch-equivalent layout)
# ----------------------------------------------------------------------------
def init_params(key, nfeat, nhead, nhid, nout, nlayers, seq_length):
    def nrm(k, shape, scale=0.05):
        return (scale * jax.random.normal(k, shape)).astype(F32)

    keys = iter(jax.random.split(key, 8 + 12 * nlayers))
    p = {
        "nhead": nhead,
        "feat_w": nrm(next(keys), (nfeat, nhid)),
        "feat_b": nrm(next(keys), (1, nhid)),
        "dec_w": nrm(next(keys), (nhid * seq_length, nout)),
        "dec_b": nrm(next(keys), (1, nout)),
        "fln_g": jnp.ones((1, nout), F32),
        "fln_b": jnp.zeros((1, nout), F32),
        "layers": [],
    }
    for _ in range(nlayers):
        lp = {
            "in_w": nrm(next(keys), (nhid, 3 * nhid)),
            "in_b": nrm(next(keys), (1, 3 * nhid)),
            "out_w": nrm(next(keys), (nhid, nhid)),
            "out_b": nrm(next(keys), (1, nhid)),
            "ln1_g": jnp.ones((1, nhid), F32),
            "ln1_b": jnp.zeros((1, nhid), F32),
            "ff1_w": nrm(next(keys), (nhid, nhid)),   # dim_feedforward = nhid
            "ff1_b": nrm(next(keys), (1, nhid)),
            "ff2_w": nrm(next(keys), (nhid, nhid)),
            "ff2_b": nrm(next(keys), (1, nhid)),
            "ln2_g": jnp.ones((1, nhid), F32),
            "ln2_b": jnp.zeros((1, nhid), F32),
        }
        p["layers"].append(lp)
    return p


def pack_params(params, seq_length):
    """Stack per-layer weights, fold 1/sqrt(dh) into the Q slice, and pre-cast
    every matmul weight to bf16 (biases / LN params stay f32)."""
    nhid = params["feat_w"].shape[1]
    nhead = params["nhead"]
    dh = nhid // nhead
    scale = float(1.0 / np.sqrt(dh))

    def stack(name):
        return jnp.stack([lp[name] for lp in params["layers"]], axis=0)

    q_scale = jnp.concatenate(
        [jnp.full((1, 1, nhid), scale, F32),
         jnp.ones((1, 1, 2 * nhid), F32)], axis=-1)               # (1, 1, 3*nhid)

    return {
        "feat_w": params["feat_w"].astype(BF16), "feat_b": params["feat_b"],
        "in_w": (stack("in_w") * q_scale).astype(BF16),
        "in_b": stack("in_b") * q_scale,
        "out_w": stack("out_w").astype(BF16), "out_b": stack("out_b"),
        "ln1_g": stack("ln1_g"), "ln1_b": stack("ln1_b"),
        "ff1_w": stack("ff1_w").astype(BF16), "ff1_b": stack("ff1_b"),
        "ff2_w": stack("ff2_w").astype(BF16), "ff2_b": stack("ff2_b"),
        "ln2_g": stack("ln2_g"), "ln2_b": stack("ln2_b"),
        "dec_w": params["dec_w"].astype(BF16),   # (S*nhid, nout), flat row order
        "dec_b": params["dec_b"],
        "fln_g": params["fln_g"], "fln_b": params["fln_b"],
    }


# ----------------------------------------------------------------------------
# Host wrapper: one pallas_call, grid over the batch (parallel -> v7x 2 TCs)
# ----------------------------------------------------------------------------
def transformer_layer_forward(packed, h, nhead):
    # h: (S, B, nfeat) -- seq-first, like nn.TransformerEncoder default
    S, B, nfeat = h.shape
    nhid = packed["feat_w"].shape[1]
    nout = packed["dec_w"].shape[-1]
    nlayers = packed["in_w"].shape[0]
    dh = nhid // nhead
    rows = B * S

    # batch-major layout so grid axis 0 == batch element
    hb = jnp.transpose(h, (1, 0, 2))                              # (B, S, nfeat)

    weights = (
        packed["feat_w"], packed["feat_b"],
        packed["in_w"], packed["in_b"], packed["out_w"], packed["out_b"],
        packed["ln1_g"], packed["ln1_b"],
        packed["ff1_w"], packed["ff1_b"], packed["ff2_w"], packed["ff2_b"],
        packed["ln2_g"], packed["ln2_b"],
        packed["dec_w"], packed["dec_b"], packed["fln_g"], packed["fln_b"],
    )

    def resident(arr):
        # whole array in VMEM, same block every grid step -> stays resident
        nd = arr.ndim
        return pl.BlockSpec(arr.shape, lambda b, _nd=nd: (0,) * _nd)

    in_specs = [pl.BlockSpec((1, S, nfeat), lambda b: (b, 0, 0))]
    in_specs += [resident(w) for w in weights]
    out_specs = pl.BlockSpec((1, 1, nout), lambda b: (b, 0, 0))

    flops = 2 * rows * nfeat * nhid                               # feature Linear
    flops += nlayers * (2 * rows * nhid * 3 * nhid                # qkv proj
                        + 4 * B * nhead * S * S * dh              # qk^T + pv
                        + 2 * rows * nhid * nhid                  # out proj
                        + 4 * rows * nhid * nhid)                 # 2-layer FFN
    flops += 2 * B * (S * nhid) * nout                            # decoder
    transcendentals = nlayers * B * nhead * S * S                 # softmax exp
    bytes_accessed = int(hb.size) * hb.dtype.itemsize
    bytes_accessed += sum(int(w.size) * w.dtype.itemsize for w in weights)
    bytes_accessed += B * nout * 4

    kernel = functools.partial(
        _fused_forward_kernel, S=S, nhead=nhead, nlayers=nlayers, nhid=nhid)

    out = pl.pallas_call(
        kernel,
        grid=(B,),
        out_shape=jax.ShapeDtypeStruct((B, 1, nout), F32),
        in_specs=in_specs,
        out_specs=out_specs,
        compiler_params=pltpu.CompilerParams(
            dimension_semantics=("parallel",),        # v7x: one batch per TC
            vmem_limit_bytes=32 * 1024 * 1024),       # explicit (v7x: 64 MiB phys)
        cost_estimate=pl.CostEstimate(
            flops=flops, transcendentals=transcendentals,
            bytes_accessed=bytes_accessed),
    )(hb, *weights)
    return out.reshape(B, nout)


# ----------------------------------------------------------------------------
# Pure-JAX reference (same math + same bf16-MXU precision policy, no Pallas)
# ----------------------------------------------------------------------------
def reference_forward(params, h):
    S, B, nfeat = h.shape
    nhid = params["feat_w"].shape[1]
    nhead = params["nhead"]
    dh = nhid // nhead
    scale = 1.0 / np.sqrt(dh)

    def mm(a, b):
        return jnp.dot(a.astype(BF16), b.astype(BF16),
                       preferred_element_type=F32)

    def ln(x, g, b, eps=EPS):
        m = jnp.mean(x, -1, keepdims=True)
        v = jnp.mean((x - m) ** 2, -1, keepdims=True)
        return (x - m) / jnp.sqrt(v + eps) * g + b

    x = mm(h.reshape(S * B, nfeat), params["feat_w"]) + params["feat_b"]
    for lp in params["layers"]:
        qkv = mm(x, lp["in_w"]) + lp["in_b"]
        q, k, v = jnp.split(qkv, 3, axis=-1)
        rh = lambda t: t.reshape(S, B, nhead, dh).transpose(1, 2, 0, 3).reshape(B * nhead, S, dh)
        qh, kh, vh = rh(q), rh(k), rh(v)
        s = jnp.einsum("bqd,bkd->bqk", (qh * scale).astype(BF16),
                       kh.astype(BF16), preferred_element_type=F32)
        p = jax.nn.softmax(s, axis=-1)
        oh = jnp.einsum("bqk,bkd->bqd", p.astype(BF16),
                        vh.astype(BF16), preferred_element_type=F32)
        o = oh.reshape(B, nhead, S, dh).transpose(2, 0, 1, 3).reshape(S * B, nhid)
        x = ln(x + (mm(o, lp["out_w"]) + lp["out_b"]), lp["ln1_g"], lp["ln1_b"])
        ff = mm(jnp.maximum(mm(x, lp["ff1_w"]) + lp["ff1_b"], 0.0),
                lp["ff2_w"]) + lp["ff2_b"]
        x = ln(x + ff, lp["ln2_g"], lp["ln2_b"])
    hb = x.reshape(S, B, nhid).transpose(1, 0, 2).reshape(B, S * nhid)
    out = mm(hb, params["dec_w"]) + params["dec_b"]
    return ln(out, params["fln_g"], params["fln_b"])


if __name__ == "__main__":
    # small shapes consistent with the module's forward:
    # h: (seq_length, batch, nfeat); nout == nhid (required by LayerNorm(nhid))
    S, B = 8, 2
    nfeat, nhead, nhid, nout, nlayers = 16, 4, 32, 32, 2

    key = jax.random.PRNGKey(0)
    kp, kx = jax.random.split(key)
    params = init_params(kp, nfeat, nhead, nhid, nout, nlayers, S)
    h = jax.random.normal(kx, (S, B, nfeat), dtype=jnp.float32)

    packed = pack_params(params, S)
    out = transformer_layer_forward(packed, h, nhead=nhead)
    out = jax.block_until_ready(out)

    ref = jax.block_until_ready(reference_forward(params, h))
    assert out.shape == (B, nout), out.shape
    np.testing.assert_allclose(np.asarray(out), np.asarray(ref), atol=2e-2, rtol=2e-2)

    print("KERNEL_OK")
</pallas_src>

<mosaic_0001>
module attributes {stable_mosaic.version = 11 : i64} {
  func.func @_fused_forward_kernel(%arg0: i32, %arg1: memref<1x8x16xf32, #tpu.memory_space<vmem>>, %arg2: memref<16x32xbf16, #tpu.memory_space<vmem>>, %arg3: memref<1x32xf32, #tpu.memory_space<vmem>>, %arg4: memref<2x32x96xbf16, #tpu.memory_space<vmem>>, %arg5: memref<2x1x96xf32, #tpu.memory_space<vmem>>, %arg6: memref<2x32x32xbf16, #tpu.memory_space<vmem>>, %arg7: memref<2x1x32xf32, #tpu.memory_space<vmem>>, %arg8: memref<2x1x32xf32, #tpu.memory_space<vmem>>, %arg9: memref<2x1x32xf32, #tpu.memory_space<vmem>>, %arg10: memref<2x32x32xbf16, #tpu.memory_space<vmem>>, %arg11: memref<2x1x32xf32, #tpu.memory_space<vmem>>, %arg12: memref<2x32x32xbf16, #tpu.memory_space<vmem>>, %arg13: memref<2x1x32xf32, #tpu.memory_space<vmem>>, %arg14: memref<2x1x32xf32, #tpu.memory_space<vmem>>, %arg15: memref<2x1x32xf32, #tpu.memory_space<vmem>>, %arg16: memref<256x32xbf16, #tpu.memory_space<vmem>>, %arg17: memref<1x32xf32, #tpu.memory_space<vmem>>, %arg18: memref<1x32xf32, #tpu.memory_space<vmem>>, %arg19: memref<1x32xf32, #tpu.memory_space<vmem>>, %arg20: memref<1x1x32xf32, #tpu.memory_space<vmem>>) attributes {dimension_semantics = [#tpu.dimension_semantics<parallel>], iteration_bounds = array<i64: 2>, scalar_prefetch = 0 : i64, scratch_operands = 0 : i64, tpu.core_type = #tpu.core_type<tc>, window_params = [{transform_indices = @transform_0, window_bounds = array<i64: 1, 8, 16>}, {pipeline_mode = #tpu.pipeline_mode<synchronous>, transform_indices = @transform_1, window_bounds = array<i64: 16, 32>}, {pipeline_mode = #tpu.pipeline_mode<synchronous>, transform_indices = @transform_2, window_bounds = array<i64: 1, 32>}, {pipeline_mode = #tpu.pipeline_mode<synchronous>, transform_indices = @transform_3, window_bounds = array<i64: 2, 32, 96>}, {pipeline_mode = #tpu.pipeline_mode<synchronous>, transform_indices = @transform_4, window_bounds = array<i64: 2, 1, 96>}, {pipeline_mode = #tpu.pipeline_mode<synchronous>, transform_indices = @transform_5, window_bounds = array<i64: 2, 32, 32>}, {pipeline_mode = #tpu.pipeline_mode<synchronous>, transform_indices = @transform_6, window_bounds = array<i64: 2, 1, 32>}, {pipeline_mode = #tpu.pipeline_mode<synchronous>, transform_indices = @transform_7, window_bounds = array<i64: 2, 1, 32>}, {pipeline_mode = #tpu.pipeline_mode<synchronous>, transform_indices = @transform_8, window_bounds = array<i64: 2, 1, 32>}, {pipeline_mode = #tpu.pipeline_mode<synchronous>, transform_indices = @transform_9, window_bounds = array<i64: 2, 32, 32>}, {pipeline_mode = #tpu.pipeline_mode<synchronous>, transform_indices = @transform_10, window_bounds = array<i64: 2, 1, 32>}, {pipeline_mode = #tpu.pipeline_mode<synchronous>, transform_indices = @transform_11, window_bounds = array<i64: 2, 32, 32>}, {pipeline_mode = #tpu.pipeline_mode<synchronous>, transform_indices = @transform_12, window_bounds = array<i64: 2, 1, 32>}, {pipeline_mode = #tpu.pipeline_mode<synchronous>, transform_indices = @transform_13, window_bounds = array<i64: 2, 1, 32>}, {pipeline_mode = #tpu.pipeline_mode<synchronous>, transform_indices = @transform_14, window_bounds = array<i64: 2, 1, 32>}, {pipeline_mode = #tpu.pipeline_mode<synchronous>, transform_indices = @transform_15, window_bounds = array<i64: 256, 32>}, {pipeline_mode = #tpu.pipeline_mode<synchronous>, transform_indices = @transform_16, window_bounds = array<i64: 1, 32>}, {pipeline_mode = #tpu.pipeline_mode<synchronous>, transform_indices = @transform_17, window_bounds = array<i64: 1, 32>}, {pipeline_mode = #tpu.pipeline_mode<synchronous>, transform_indices = @transform_18, window_bounds = array<i64: 1, 32>}, {transform_indices = @transform_19, window_bounds = array<i64: 1, 1, 32>}]} {
    %c0 = arith.constant 0 : index
    %c0_0 = arith.constant 0 : index
    %c0_1 = arith.constant 0 : index
    %0 = vector.load %arg1[%c0, %c0_0, %c0_1] : memref<1x8x16xf32, #tpu.memory_space<vmem>>, vector<1x8x16xf32>
    %1 = vector.shape_cast %0 : vector<1x8x16xf32> to vector<8x16xf32>
    %c0_2 = arith.constant 0 : index
    %c0_3 = arith.constant 0 : index
    %2 = vector.load %arg2[%c0_2, %c0_3] : memref<16x32xbf16, #tpu.memory_space<vmem>>, vector<16x32xbf16>
    %3 = arith.truncf %1 : vector<8x16xf32> to vector<8x16xbf16>
    %cst = arith.constant dense<0.000000e+00> : vector<8x32xf32>
    %4 = tpu.matmul %3, %2, %cst {dimension_numbers = #tpu.dot_dimension_numbers<[1], [0], [0], [1], [0, 0, 1, 1], [], []>} : vector<8x16xbf16>, vector<16x32xbf16>, vector<8x32xf32> -> vector<8x32xf32>
    %c0_4 = arith.constant 0 : index
    %c0_5 = arith.constant 0 : index
    %5 = vector.load %arg3[%c0_4, %c0_5] : memref<1x32xf32, #tpu.memory_space<vmem>>, vector<1x32xf32>
    %6 = vector.broadcast %5 : vector<1x32xf32> to vector<8x32xf32>
    %7 = arith.addf %4, %6 : vector<8x32xf32>
    %c0_6 = arith.constant 0 : index
    %c0_7 = arith.constant 0 : index
    %c0_8 = arith.constant 0 : index
    %8 = vector.load %arg4[%c0_6, %c0_7, %c0_8] : memref<2x32x96xbf16, #tpu.memory_space<vmem>>, vector<1x32x96xbf16>
    %9 = vector.shape_cast %8 : vector<1x32x96xbf16> to vector<32x96xbf16>
    %10 = arith.truncf %7 : vector<8x32xf32> to vector<8x32xbf16>
    %cst_9 = arith.constant dense<0.000000e+00> : vector<8x96xf32>
    %11 = tpu.matmul %10, %9, %cst_9 {dimension_numbers = #tpu.dot_dimension_numbers<[1], [0], [0], [1], [0, 0, 1, 1], [], []>} : vector<8x32xbf16>, vector<32x96xbf16>, vector<8x96xf32> -> vector<8x96xf32>
    %c0_10 = arith.constant 0 : index
    %c0_11 = arith.constant 0 : index
    %c0_12 = arith.constant 0 : index
    %12 = vector.load %arg5[%c0_10, %c0_11, %c0_12] : memref<2x1x96xf32, #tpu.memory_space<vmem>>, vector<1x1x96xf32>
    %13 = vector.shape_cast %12 : vector<1x1x96xf32> to vector<1x96xf32>
    %14 = vector.broadcast %13 : vector<1x96xf32> to vector<8x96xf32>
    %15 = arith.addf %11, %14 : vector<8x96xf32>
    %16 = arith.truncf %15 : vector<8x96xf32> to vector<8x96xbf16>
    %17 = vector.extract_strided_slice %16 {offsets = [0, 0], sizes = [8, 8], strides = [1, 1]} : vector<8x96xbf16> to vector<8x8xbf16>
    %18 = vector.extract_strided_slice %16 {offsets = [0, 32], sizes = [8, 8], strides = [1, 1]} : vector<8x96xbf16> to vector<8x8xbf16>
    %19 = vector.extract_strided_slice %16 {offsets = [0, 64], sizes = [8, 8], strides = [1, 1]} : vector<8x96xbf16> to vector<8x8xbf16>
    %cst_13 = arith.constant dense<0.000000e+00> : vector<8x8xf32>
    %20 = tpu.matmul %17, %18, %cst_13 {dimension_numbers = #tpu.dot_dimension_numbers<[1], [1], [0], [0], [0, 0, 1, 0], [], []>} : vector<8x8xbf16>, vector<8x8xbf16>, vector<8x8xf32> -> vector<8x8xf32>
    %cst_14 = arith.constant dense<0xFF800000> : vector<8xf32>
    %21 = vector.multi_reduction <maximumf>, %20, %cst_14 [1] : vector<8x8xf32> to vector<8xf32>
    %22 = vector.shape_cast %21 : vector<8xf32> to vector<8x1xf32>
    %23 = vector.broadcast %22 : vector<8x1xf32> to vector<8x8xf32>
    %24 = arith.subf %20, %23 : vector<8x8xf32>
    %25 = math.exp %24 : vector<8x8xf32>
    %cst_15 = arith.constant dense<0.000000e+00> : vector<8xf32>
    %26 = vector.multi_reduction <add>, %25, %cst_15 [1] : vector<8x8xf32> to vector<8xf32>
    %27 = vector.shape_cast %26 : vector<8xf32> to vector<8x1xf32>
    %28 = tpu.reciprocal %27 {approx = true} : vector<8x1xf32> -> vector<8x1xf32>
    %29 = vector.broadcast %28 : vector<8x1xf32> to vector<8x8xf32>
    %30 = arith.mulf %25, %29 : vector<8x8xf32>
    %31 = arith.truncf %30 : vector<8x8xf32> to vector<8x8xbf16>
    %cst_16 = arith.constant dense<0.000000e+00> : vector<8x8xf32>
    %32 = tpu.matmul %31, %19, %cst_16 {dimension_numbers = #tpu.dot_dimension_numbers<[1], [0], [0], [1], [0, 0, 1, 1], [], []>} : vector<8x8xbf16>, vector<8x8xbf16>, vector<8x8xf32> -> vector<8x8xf32>
    %33 = vector.extract_strided_slice %16 {offsets = [0, 8], sizes = [8, 8], strides = [1, 1]} : vector<8x96xbf16> to vector<8x8xbf16>
    %34 = vector.extract_strided_slice %16 {offsets = [0, 40], sizes = [8, 8], strides = [1, 1]} : vector<8x96xbf16> to vector<8x8xbf16>
    %35 = vector.extract_strided_slice %16 {offsets = [0, 72], sizes = [8, 8], strides = [1, 1]} : vector<8x96xbf16> to vector<8x8xbf16>
    %cst_17 = arith.constant dense<0.000000e+00> : vector<8x8xf32>
    %36 = tpu.matmul %33, %34, %cst_17 {dimension_numbers = #tpu.dot_dimension_numbers<[1], [1], [0], [0], [0, 0, 1, 0], [], []>} : vector<8x8xbf16>, vector<8x8xbf16>, vector<8x8xf32> -> vector<8x8xf32>
    %cst_18 = arith.constant dense<0xFF800000> : vector<8xf32>
    %37 = vector.multi_reduction <maximumf>, %36, %cst_18 [1] : vector<8x8xf32> to vector<8xf32>
    %38 = vector.shape_cast %37 : vector<8xf32> to vector<8x1xf32>
    %39 = vector.broadcast %38 : vector<8x1xf32> to vector<8x8xf32>
    %40 = arith.subf %36, %39 : vector<8x8xf32>
    %41 = math.exp %40 : vector<8x8xf32>
    %cst_19 = arith.constant dense<0.000000e+00> : vector<8xf32>
    %42 = vector.multi_reduction <add>, %41, %cst_19 [1] : vector<8x8xf32> to vector<8xf32>
    %43 = vector.shape_cast %42 : vector<8xf32> to vector<8x1xf32>
    %44 = tpu.reciprocal %43 {approx = true} : vector<8x1xf32> -> vector<8x1xf32>
    %45 = vector.broadcast %44 : vector<8x1xf32> to vector<8x8xf32>
    %46 = arith.mulf %41, %45 : vector<8x8xf32>
    %47 = arith.truncf %46 : vector<8x8xf32> to vector<8x8xbf16>
    %cst_20 = arith.constant dense<0.000000e+00> : vector<8x8xf32>
    %48 = tpu.matmul %47, %35, %cst_20 {dimension_numbers = #tpu.dot_dimension_numbers<[1], [0], [0], [1], [0, 0, 1, 1], [], []>} : vector<8x8xbf16>, vector<8x8xbf16>, vector<8x8xf32> -> vector<8x8xf32>
    %49 = vector.extract_strided_slice %16 {offsets = [0, 16], sizes = [8, 8], strides = [1, 1]} : vector<8x96xbf16> to vector<8x8xbf16>
    %50 = vector.extract_strided_slice %16 {offsets = [0, 48], sizes = [8, 8], strides = [1, 1]} : vector<8x96xbf16> to vector<8x8xbf16>
    %51 = vector.extract_strided_slice %16 {offsets = [0, 80], sizes = [8, 8], strides = [1, 1]} : vector<8x96xbf16> to vector<8x8xbf16>
    %cst_21 = arith.constant dense<0.000000e+00> : vector<8x8xf32>
    %52 = tpu.matmul %49, %50, %cst_21 {dimension_numbers = #tpu.dot_dimension_numbers<[1], [1], [0], [0], [0, 0, 1, 0], [], []>} : vector<8x8xbf16>, vector<8x8xbf16>, vector<8x8xf32> -> vector<8x8xf32>
    %cst_22 = arith.constant dense<0xFF800000> : vector<8xf32>
    %53 = vector.multi_reduction <maximumf>, %52, %cst_22 [1] : vector<8x8xf32> to vector<8xf32>
    %54 = vector.shape_cast %53 : vector<8xf32> to vector<8x1xf32>
    %55 = vector.broadcast %54 : vector<8x1xf32> to vector<8x8xf32>
    %56 = arith.subf %52, %55 : vector<8x8xf32>
    %57 = math.exp %56 : vector<8x8xf32>
    %cst_23 = arith.constant dense<0.000000e+00> : vector<8xf32>
    %58 = vector.multi_reduction <add>, %57, %cst_23 [1] : vector<8x8xf32> to vector<8xf32>
    %59 = vector.shape_cast %58 : vector<8xf32> to vector<8x1xf32>
    %60 = tpu.reciprocal %59 {approx = true} : vector<8x1xf32> -> vector<8x1xf32>
    %61 = vector.broadcast %60 : vector<8x1xf32> to vector<8x8xf32>
    %62 = arith.mulf %57, %61 : vector<8x8xf32>
    %63 = arith.truncf %62 : vector<8x8xf32> to vector<8x8xbf16>
    %cst_24 = arith.constant dense<0.000000e+00> : vector<8x8xf32>
    %64 = tpu.matmul %63, %51, %cst_24 {dimension_numbers = #tpu.dot_dimension_numbers<[1], [0], [0], [1], [0, 0, 1, 1], [], []>} : vector<8x8xbf16>, vector<8x8xbf16>, vector<8x8xf32> -> vector<8x8xf32>
    %65 = vector.extract_strided_slice %16 {offsets = [0, 24], sizes = [8, 8], strides = [1, 1]} : vector<8x96xbf16> to vector<8x8xbf16>
    %66 = vector.extract_strided_slice %16 {offsets = [0, 56], sizes = [8, 8], strides = [1, 1]} : vector<8x96xbf16> to vector<8x8xbf16>
    %67 = vector.extract_strided_slice %16 {offsets = [0, 88], sizes = [8, 8], strides = [1, 1]} : vector<8x96xbf16> to vector<8x8xbf16>
    %cst_25 = arith.constant dense<0.000000e+00> : vector<8x8xf32>
    %68 = tpu.matmul %65, %66, %cst_25 {dimension_numbers = #tpu.dot_dimension_numbers<[1], [1], [0], [0], [0, 0, 1, 0], [], []>} : vector<8x8xbf16>, vector<8x8xbf16>, vector<8x8xf32> -> vector<8x8xf32>
    %cst_26 = arith.constant dense<0xFF800000> : vector<8xf32>
    %69 = vector.multi_reduction <maximumf>, %68, %cst_26 [1] : vector<8x8xf32> to vector<8xf32>
    %70 = vector.shape_cast %69 : vector<8xf32> to vector<8x1xf32>
    %71 = vector.broadcast %70 : vector<8x1xf32> to vector<8x8xf32>
    %72 = arith.subf %68, %71 : vector<8x8xf32>
    %73 = math.exp %72 : vector<8x8xf32>
    %cst_27 = arith.constant dense<0.000000e+00> : vector<8xf32>
    %74 = vector.multi_reduction <add>, %73, %cst_27 [1] : vector<8x8xf32> to vector<8xf32>
    %75 = vector.shape_cast %74 : vector<8xf32> to vector<8x1xf32>
    %76 = tpu.reciprocal %75 {approx = true} : vector<8x1xf32> -> vector<8x1xf32>
    %77 = vector.broadcast %76 : vector<8x1xf32> to vector<8x8xf32>
    %78 = arith.mulf %73, %77 : vector<8x8xf32>
    %79 = arith.truncf %78 : vector<8x8xf32> to vector<8x8xbf16>
    %cst_28 = arith.constant dense<0.000000e+00> : vector<8x8xf32>
    %80 = tpu.matmul %79, %67, %cst_28 {dimension_numbers = #tpu.dot_dimension_numbers<[1], [0], [0], [1], [0, 0, 1, 1], [], []>} : vector<8x8xbf16>, vector<8x8xbf16>, vector<8x8xf32> -> vector<8x8xf32>
    %81 = tpu.concatenate %32, %48, %64, %80 in 1 : vector<8x8xf32>, vector<8x8xf32>, vector<8x8xf32>, vector<8x8xf32> -> vector<8x32xf32>
    %c0_29 = arith.constant 0 : index
    %c0_30 = arith.constant 0 : index
    %c0_31 = arith.constant 0 : index
    %82 = vector.load %arg6[%c0_29, %c0_30, %c0_31] : memref<2x32x32xbf16, #tpu.memory_space<vmem>>, vector<1x32x32xbf16>
    %83 = vector.shape_cast %82 : vector<1x32x32xbf16> to vector<32x32xbf16>
    %84 = arith.truncf %81 : vector<8x32xf32> to vector<8x32xbf16>
    %cst_32 = arith.constant dense<0.000000e+00> : vector<8x32xf32>
    %85 = tpu.matmul %84, %83, %cst_32 {dimension_numbers = #tpu.dot_dimension_numbers<[1], [0], [0], [1], [0, 0, 1, 1], [], []>} : vector<8x32xbf16>, vector<32x32xbf16>, vector<8x32xf32> -> vector<8x32xf32>
    %c0_33 = arith.constant 0 : index
    %c0_34 = arith.constant 0 : index
    %c0_35 = arith.constant 0 : index
    %86 = vector.load %arg7[%c0_33, %c0_34, %c0_35] : memref<2x1x32xf32, #tpu.memory_space<vmem>>, vector<1x1x32xf32>
    %87 = vector.shape_cast %86 : vector<1x1x32xf32> to vector<1x32xf32>
    %88 = vector.broadcast %87 : vector<1x32xf32> to vector<8x32xf32>
    %89 = arith.addf %85, %88 : vector<8x32xf32>
    %90 = arith.addf %7, %89 : vector<8x32xf32>
    %c0_36 = arith.constant 0 : index
    %c0_37 = arith.constant 0 : index
    %c0_38 = arith.constant 0 : index
    %91 = vector.load %arg8[%c0_36, %c0_37, %c0_38] : memref<2x1x32xf32, #tpu.memory_space<vmem>>, vector<1x1x32xf32>
    %92 = vector.shape_cast %91 : vector<1x1x32xf32> to vector<1x32xf32>
    %c0_39 = arith.constant 0 : index
    %c0_40 = arith.constant 0 : index
    %c0_41 = arith.constant 0 : index
    %93 = vector.load %arg9[%c0_39, %c0_40, %c0_41] : memref<2x1x32xf32, #tpu.memory_space<vmem>>, vector<1x1x32xf32>
    %94 = vector.shape_cast %93 : vector<1x1x32xf32> to vector<1x32xf32>
    %cst_42 = arith.constant dense<0.000000e+00> : vector<8xf32>
    %95 = vector.multi_reduction <add>, %90, %cst_42 [1] : vector<8x32xf32> to vector<8xf32>
    %96 = vector.shape_cast %95 : vector<8xf32> to vector<8x1xf32>
    %cst_43 = arith.constant 3.200000e+01 : f32
    %97 = vector.broadcast %cst_43 : f32 to vector<8x1xf32>
    %98 = arith.divf %96, %97 : vector<8x1xf32>
    %99 = vector.broadcast %98 : vector<8x1xf32> to vector<8x32xf32>
    %100 = arith.subf %90, %99 : vector<8x32xf32>
    %101 = arith.mulf %100, %100 : vector<8x32xf32>
    %cst_44 = arith.constant dense<0.000000e+00> : vector<8xf32>
    %102 = vector.multi_reduction <add>, %101, %cst_44 [1] : vector<8x32xf32> to vector<8xf32>
    %103 = vector.shape_cast %102 : vector<8xf32> to vector<8x1xf32>
    %cst_45 = arith.constant 3.200000e+01 : f32
    %104 = vector.broadcast %cst_45 : f32 to vector<8x1xf32>
    %105 = arith.divf %103, %104 : vector<8x1xf32>
    %cst_46 = arith.constant 9.99999974E-6 : f32
    %106 = vector.broadcast %cst_46 : f32 to vector<8x1xf32>
    %107 = arith.addf %105, %106 : vector<8x1xf32>
    %108 = math.rsqrt %107 : vector<8x1xf32>
    %109 = vector.broadcast %108 : vector<8x1xf32> to vector<8x32xf32>
    %110 = arith.mulf %100, %109 : vector<8x32xf32>
    %111 = vector.broadcast %92 : vector<1x32xf32> to vector<8x32xf32>
    %112 = arith.mulf %110, %111 : vector<8x32xf32>
    %113 = vector.broadcast %94 : vector<1x32xf32> to vector<8x32xf32>
    %114 = arith.addf %112, %113 : vector<8x32xf32>
    %c0_47 = arith.constant 0 : index
    %c0_48 = arith.constant 0 : index
    %c0_49 = arith.constant 0 : index
    %115 = vector.load %arg10[%c0_47, %c0_48, %c0_49] : memref<2x32x32xbf16, #tpu.memory_space<vmem>>, vector<1x32x32xbf16>
    %116 = vector.shape_cast %115 : vector<1x32x32xbf16> to vector<32x32xbf16>
    %117 = arith.truncf %114 : vector<8x32xf32> to vector<8x32xbf16>
    %cst_50 = arith.constant dense<0.000000e+00> : vector<8x32xf32>
    %118 = tpu.matmul %117, %116, %cst_50 {dimension_numbers = #tpu.dot_dimension_numbers<[1], [0], [0], [1], [0, 0, 1, 1], [], []>} : vector<8x32xbf16>, vector<32x32xbf16>, vector<8x32xf32> -> vector<8x32xf32>
    %c0_51 = arith.constant 0 : index
    %c0_52 = arith.constant 0 : index
    %c0_53 = arith.constant 0 : index
    %119 = vector.load %arg11[%c0_51, %c0_52, %c0_53] : memref<2x1x32xf32, #tpu.memory_space<vmem>>, vector<1x1x32xf32>
    %120 = vector.shape_cast %119 : vector<1x1x32xf32> to vector<1x32xf32>
    %121 = vector.broadcast %120 : vector<1x32xf32> to vector<8x32xf32>
    %122 = arith.addf %118, %121 : vector<8x32xf32>
    %cst_54 = arith.constant 0.000000e+00 : f32
    %123 = vector.broadcast %cst_54 : f32 to vector<8x32xf32>
    %124 = arith.maximumf %122, %123 : vector<8x32xf32>
    %c0_55 = arith.constant 0 : index
    %c0_56 = arith.constant 0 : index
    %c0_57 = arith.constant 0 : index
    %125 = vector.load %arg12[%c0_55, %c0_56, %c0_57] : memref<2x32x32xbf16, #tpu.memory_space<vmem>>, vector<1x32x32xbf16>
    %126 = vector.shape_cast %125 : vector<1x32x32xbf16> to vector<32x32xbf16>
    %127 = arith.truncf %124 : vector<8x32xf32> to vector<8x32xbf16>
    %cst_58 = arith.constant dense<0.000000e+00> : vector<8x32xf32>
    %128 = tpu.matmul %127, %126, %cst_58 {dimension_numbers = #tpu.dot_dimension_numbers<[1], [0], [0], [1], [0, 0, 1, 1], [], []>} : vector<8x32xbf16>, vector<32x32xbf16>, vector<8x32xf32> -> vector<8x32xf32>
    %c0_59 = arith.constant 0 : index
    %c0_60 = arith.constant 0 : index
    %c0_61 = arith.constant 0 : index
    %129 = vector.load %arg13[%c0_59, %c0_60, %c0_61] : memref<2x1x32xf32, #tpu.memory_space<vmem>>, vector<1x1x32xf32>
    %130 = vector.shape_cast %129 : vector<1x1x32xf32> to vector<1x32xf32>
    %131 = vector.broadcast %130 : vector<1x32xf32> to vector<8x32xf32>
    %132 = arith.addf %128, %131 : vector<8x32xf32>
    %133 = arith.addf %114, %132 : vector<8x32xf32>
    %c0_62 = arith.constant 0 : index
    %c0_63 = arith.constant 0 : index
    %c0_64 = arith.constant 0 : index
    %134 = vector.load %arg14[%c0_62, %c0_63, %c0_64] : memref<2x1x32xf32, #tpu.memory_space<vmem>>, vector<1x1x32xf32>
    %135 = vector.shape_cast %134 : vector<1x1x32xf32> to vector<1x32xf32>
    %c0_65 = arith.constant 0 : index
    %c0_66 = arith.constant 0 : index
    %c0_67 = arith.constant 0 : index
    %136 = vector.load %arg15[%c0_65, %c0_66, %c0_67] : memref<2x1x32xf32, #tpu.memory_space<vmem>>, vector<1x1x32xf32>
    %137 = vector.shape_cast %136 : vector<1x1x32xf32> to vector<1x32xf32>
    %cst_68 = arith.constant dense<0.000000e+00> : vector<8xf32>
    %138 = vector.multi_reduction <add>, %133, %cst_68 [1] : vector<8x32xf32> to vector<8xf32>
    %139 = vector.shape_cast %138 : vector<8xf32> to vector<8x1xf32>
    %cst_69 = arith.constant 3.200000e+01 : f32
    %140 = vector.broadcast %cst_69 : f32 to vector<8x1xf32>
    %141 = arith.divf %139, %140 : vector<8x1xf32>
    %142 = vector.broadcast %141 : vector<8x1xf32> to vector<8x32xf32>
    %143 = arith.subf %133, %142 : vector<8x32xf32>
    %144 = arith.mulf %143, %143 : vector<8x32xf32>
    %cst_70 = arith.constant dense<0.000000e+00> : vector<8xf32>
    %145 = vector.multi_reduction <add>, %144, %cst_70 [1] : vector<8x32xf32> to vector<8xf32>
    %146 = vector.shape_cast %145 : vector<8xf32> to vector<8x1xf32>
    %cst_71 = arith.constant 3.200000e+01 : f32
    %147 = vector.broadcast %cst_71 : f32 to vector<8x1xf32>
    %148 = arith.divf %146, %147 : vector<8x1xf32>
    %cst_72 = arith.constant 9.99999974E-6 : f32
    %149 = vector.broadcast %cst_72 : f32 to vector<8x1xf32>
    %150 = arith.addf %148, %149 : vector<8x1xf32>
    %151 = math.rsqrt %150 : vector<8x1xf32>
    %152 = vector.broadcast %151 : vector<8x1xf32> to vector<8x32xf32>
    %153 = arith.mulf %143, %152 : vector<8x32xf32>
    %154 = vector.broadcast %135 : vector<1x32xf32> to vector<8x32xf32>
    %155 = arith.mulf %153, %154 : vector<8x32xf32>
    %156 = vector.broadcast %137 : vector<1x32xf32> to vector<8x32xf32>
    %157 = arith.addf %155, %156 : vector<8x32xf32>
    %c1 = arith.constant 1 : index
    %c0_73 = arith.constant 0 : index
    %c0_74 = arith.constant 0 : index
    %158 = vector.load %arg4[%c1, %c0_73, %c0_74] : memref<2x32x96xbf16, #tpu.memory_space<vmem>>, vector<1x32x96xbf16>
    %159 = vector.shape_cast %158 : vector<1x32x96xbf16> to vector<32x96xbf16>
    %160 = arith.truncf %157 : vector<8x32xf32> to vector<8x32xbf16>
    %cst_75 = arith.constant dense<0.000000e+00> : vector<8x96xf32>
    %161 = tpu.matmul %160, %159, %cst_75 {dimension_numbers = #tpu.dot_dimension_numbers<[1], [0], [0], [1], [0, 0, 1, 1], [], []>} : vector<8x32xbf16>, vector<32x96xbf16>, vector<8x96xf32> -> vector<8x96xf32>
    %c1_76 = arith.constant 1 : index
    %c0_77 = arith.constant 0 : index
    %c0_78 = arith.constant 0 : index
    %162 = vector.load %arg5[%c1_76, %c0_77, %c0_78] : memref<2x1x96xf32, #tpu.memory_space<vmem>>, vector<1x1x96xf32>
    %163 = vector.shape_cast %162 : vector<1x1x96xf32> to vector<1x96xf32>
    %164 = vector.broadcast %163 : vector<1x96xf32> to vector<8x96xf32>
    %165 = arith.addf %161, %164 : vector<8x96xf32>
    %166 = arith.truncf %165 : vector<8x96xf32> to vector<8x96xbf16>
    %167 = vector.extract_strided_slice %166 {offsets = [0, 0], sizes = [8, 8], strides = [1, 1]} : vector<8x96xbf16> to vector<8x8xbf16>
    %168 = vector.extract_strided_slice %166 {offsets = [0, 32], sizes = [8, 8], strides = [1, 1]} : vector<8x96xbf16> to vector<8x8xbf16>
    %169 = vector.extract_strided_slice %166 {offsets = [0, 64], sizes = [8, 8], strides = [1, 1]} : vector<8x96xbf16> to vector<8x8xbf16>
    %cst_79 = arith.constant dense<0.000000e+00> : vector<8x8xf32>
    %170 = tpu.matmul %167, %168, %cst_79 {dimension_numbers = #tpu.dot_dimension_numbers<[1], [1], [0], [0], [0, 0, 1, 0], [], []>} : vector<8x8xbf16>, vector<8x8xbf16>, vector<8x8xf32> -> vector<8x8xf32>
    %cst_80 = arith.constant dense<0xFF800000> : vector<8xf32>
    %171 = vector.multi_reduction <maximumf>, %170, %cst_80 [1] : vector<8x8xf32> to vector<8xf32>
    %172 = vector.shape_cast %171 : vector<8xf32> to vector<8x1xf32>
    %173 = vector.broadcast %172 : vector<8x1xf32> to vector<8x8xf32>
    %174 = arith.subf %170, %173 : vector<8x8xf32>
    %175 = math.exp %174 : vector<8x8xf32>
    %cst_81 = arith.constant dense<0.000000e+00> : vector<8xf32>
    %176 = vector.multi_reduction <add>, %175, %cst_81 [1] : vector<8x8xf32> to vector<8xf32>
    %177 = vector.shape_cast %176 : vector<8xf32> to vector<8x1xf32>
    %178 = tpu.reciprocal %177 {approx = true} : vector<8x1xf32> -> vector<8x1xf32>
    %179 = vector.broadcast %178 : vector<8x1xf32> to vector<8x8xf32>
    %180 = arith.mulf %175, %179 : vector<8x8xf32>
    %181 = arith.truncf %180 : vector<8x8xf32> to vector<8x8xbf16>
    %cst_82 = arith.constant dense<0.000000e+00> : vector<8x8xf32>
    %182 = tpu.matmul %181, %169, %cst_82 {dimension_numbers = #tpu.dot_dimension_numbers<[1], [0], [0], [1], [0, 0, 1, 1], [], []>} : vector<8x8xbf16>, vector<8x8xbf16>, vector<8x8xf32> -> vector<8x8xf32>
    %183 = vector.extract_strided_slice %166 {offsets = [0, 8], sizes = [8, 8], strides = [1, 1]} : vector<8x96xbf16> to vector<8x8xbf16>
    %184 = vector.extract_strided_slice %166 {offsets = [0, 40], sizes = [8, 8], strides = [1, 1]} : vector<8x96xbf16> to vector<8x8xbf16>
    %185 = vector.extract_strided_slice %166 {offsets = [0, 72], sizes = [8, 8], strides = [1, 1]} : vector<8x96xbf16> to vector<8x8xbf16>
    %cst_83 = arith.constant dense<0.000000e+00> : vector<8x8xf32>
    %186 = tpu.matmul %183, %184, %cst_83 {dimension_numbers = #tpu.dot_dimension_numbers<[1], [1], [0], [0], [0, 0, 1, 0], [], []>} : vector<8x8xbf16>, vector<8x8xbf16>, vector<8x8xf32> -> vector<8x8xf32>
    %cst_84 = arith.constant dense<0xFF800000> : vector<8xf32>
    %187 = vector.multi_reduction <maximumf>, %186, %cst_84 [1] : vector<8x8xf32> to vector<8xf32>
    %188 = vector.shape_cast %187 : vector<8xf32> to vector<8x1xf32>
    %189 = vector.broadcast %188 : vector<8x1xf32> to vector<8x8xf32>
    %190 = arith.subf %186, %189 : vector<8x8xf32>
    %191 = math.exp %190 : vector<8x8xf32>
    %cst_85 = arith.constant dense<0.000000e+00> : vector<8xf32>
    %192 = vector.multi_reduction <add>, %191, %cst_85 [1] : vector<8x8xf32> to vector<8xf32>
    %193 = vector.shape_cast %192 : vector<8xf32> to vector<8x1xf32>
    %194 = tpu.reciprocal %193 {approx = true} : vector<8x1xf32> -> vector<8x1xf32>
    %195 = vector.broadcast %194 : vector<8x1xf32> to vector<8x8xf32>
    %196 = arith.mulf %191, %195 : vector<8x8xf32>
    %197 = arith.truncf %196 : vector<8x8xf32> to vector<8x8xbf16>
    %cst_86 = arith.constant dense<0.000000e+00> : vector<8x8xf32>
    %198 = tpu.matmul %197, %185, %cst_86 {dimension_numbers = #tpu.dot_dimension_numbers<[1], [0], [0], [1], [0, 0, 1, 1], [], []>} : vector<8x8xbf16>, vector<8x8xbf16>, vector<8x8xf32> -> vector<8x8xf32>
    %199 = vector.extract_strided_slice %166 {offsets = [0, 16], sizes = [8, 8], strides = [1, 1]} : vector<8x96xbf16> to vector<8x8xbf16>
    %200 = vector.extract_strided_slice %166 {offsets = [0, 48], sizes = [8, 8], strides = [1, 1]} : vector<8x96xbf16> to vector<8x8xbf16>
    %201 = vector.extract_strided_slice %166 {offsets = [0, 80], sizes = [8, 8], strides = [1, 1]} : vector<8x96xbf16> to vector<8x8xbf16>
    %cst_87 = arith.constant dense<0.000000e+00> : vector<8x8xf32>
    %202 = tpu.matmul %199, %200, %cst_87 {dimension_numbers = #tpu.dot_dimension_numbers<[1], [1], [0], [0], [0, 0, 1, 0], [], []>} : vector<8x8xbf16>, vector<8x8xbf16>, vector<8x8xf32> -> vector<8x8xf32>
    %cst_88 = arith.constant dense<0xFF800000> : vector<8xf32>
    %203 = vector.multi_reduction <maximumf>, %202, %cst_88 [1] : vector<8x8xf32> to vector<8xf32>
    %204 = vector.shape_cast %203 : vector<8xf32> to vector<8x1xf32>
    %205 = vector.broadcast %204 : vector<8x1xf32> to vector<8x8xf32>
    %206 = arith.subf %202, %205 : vector<8x8xf32>
    %207 = math.exp %206 : vector<8x8xf32>
    %cst_89 = arith.constant dense<0.000000e+00> : vector<8xf32>
    %208 = vector.multi_reduction <add>, %207, %cst_89 [1] : vector<8x8xf32> to vector<8xf32>
    %209 = vector.shape_cast %208 : vector<8xf32> to vector<8x1xf32>
    %210 = tpu.reciprocal %209 {approx = true} : vector<8x1xf32> -> vector<8x1xf32>
    %211 = vector.broadcast %210 : vector<8x1xf32> to vector<8x8xf32>
    %212 = arith.mulf %207, %211 : vector<8x8xf32>
    %213 = arith.truncf %212 : vector<8x8xf32> to vector<8x8xbf16>
    %cst_90 = arith.constant dense<0.000000e+00> : vector<8x8xf32>
    %214 = tpu.matmul %213, %201, %cst_90 {dimension_numbers = #tpu.dot_dimension_numbers<[1], [0], [0], [1], [0, 0, 1, 1], [], []>} : vector<8x8xbf16>, vector<8x8xbf16>, vector<8x8xf32> -> vector<8x8xf32>
    %215 = vector.extract_strided_slice %166 {offsets = [0, 24], sizes = [8, 8], strides = [1, 1]} : vector<8x96xbf16> to vector<8x8xbf16>
    %216 = vector.extract_strided_slice %166 {offsets = [0, 56], sizes = [8, 8], strides = [1, 1]} : vector<8x96xbf16> to vector<8x8xbf16>
    %217 = vector.extract_strided_slice %166 {offsets = [0, 88], sizes = [8, 8], strides = [1, 1]} : vector<8x96xbf16> to vector<8x8xbf16>
    %cst_91 = arith.constant dense<0.000000e+00> : vector<8x8xf32>
    %218 = tpu.matmul %215, %216, %cst_91 {dimension_numbers = #tpu.dot_dimension_numbers<[1], [1], [0], [0], [0, 0, 1, 0], [], []>} : vector<8x8xbf16>, vector<8x8xbf16>, vector<8x8xf32> -> vector<8x8xf32>
    %cst_92 = arith.constant dense<0xFF800000> : vector<8xf32>
    %219 = vector.multi_reduction <maximumf>, %218, %cst_92 [1] : vector<8x8xf32> to vector<8xf32>
    %220 = vector.shape_cast %219 : vector<8xf32> to vector<8x1xf32>
    %221 = vector.broadcast %220 : vector<8x1xf32> to vector<8x8xf32>
    %222 = arith.subf %218, %221 : vector<8x8xf32>
    %223 = math.exp %222 : vector<8x8xf32>
    %cst_93 = arith.constant dense<0.000000e+00> : vector<8xf32>
    %224 = vector.multi_reduction <add>, %223, %cst_93 [1] : vector<8x8xf32> to vector<8xf32>
    %225 = vector.shape_cast %224 : vector<8xf32> to vector<8x1xf32>
    %226 = tpu.reciprocal %225 {approx = true} : vector<8x1xf32> -> vector<8x1xf32>
    %227 = vector.broadcast %226 : vector<8x1xf32> to vector<8x8xf32>
    %228 = arith.mulf %223, %227 : vector<8x8xf32>
    %229 = arith.truncf %228 : vector<8x8xf32> to vector<8x8xbf16>
    %cst_94 = arith.constant dense<0.000000e+00> : vector<8x8xf32>
    %230 = tpu.matmul %229, %217, %cst_94 {dimension_numbers = #tpu.dot_dimension_numbers<[1], [0], [0], [1], [0, 0, 1, 1], [], []>} : vector<8x8xbf16>, vector<8x8xbf16>, vector<8x8xf32> -> vector<8x8xf32>
    %231 = tpu.concatenate %182, %198, %214, %230 in 1 : vector<8x8xf32>, vector<8x8xf32>, vector<8x8xf32>, vector<8x8xf32> -> vector<8x32xf32>
    %c1_95 = arith.constant 1 : index
    %c0_96 = arith.constant 0 : index
    %c0_97 = arith.constant 0 : index
    %232 = vector.load %arg6[%c1_95, %c0_96, %c0_97] : memref<2x32x32xbf16, #tpu.memory_space<vmem>>, vector<1x32x32xbf16>
    %233 = vector.shape_cast %232 : vector<1x32x32xbf16> to vector<32x32xbf16>
    %234 = arith.truncf %231 : vector<8x32xf32> to vector<8x32xbf16>
    %cst_98 = arith.constant dense<0.000000e+00> : vector<8x32xf32>
    %235 = tpu.matmul %234, %233, %cst_98 {dimension_numbers = #tpu.dot_dimension_numbers<[1], [0], [0], [1], [0, 0, 1, 1], [], []>} : vector<8x32xbf16>, vector<32x32xbf16>, vector<8x32xf32> -> vector<8x32xf32>
    %c1_99 = arith.constant 1 : index
    %c0_100 = arith.constant 0 : index
    %c0_101 = arith.constant 0 : index
    %236 = vector.load %arg7[%c1_99, %c0_100, %c0_101] : memref<2x1x32xf32, #tpu.memory_space<vmem>>, vector<1x1x32xf32>
    %237 = vector.shape_cast %236 : vector<1x1x32xf32> to vector<1x32xf32>
    %238 = vector.broadcast %237 : vector<1x32xf32> to vector<8x32xf32>
    %239 = arith.addf %235, %238 : vector<8x32xf32>
    %240 = arith.addf %157, %239 : vector<8x32xf32>
    %c1_102 = arith.constant 1 : index
    %c0_103 = arith.constant 0 : index
    %c0_104 = arith.constant 0 : index
    %241 = vector.load %arg8[%c1_102, %c0_103, %c0_104] : memref<2x1x32xf32, #tpu.memory_space<vmem>>, vector<1x1x32xf32>
    %242 = vector.shape_cast %241 : vector<1x1x32xf32> to vector<1x32xf32>
    %c1_105 = arith.constant 1 : index
    %c0_106 = arith.constant 0 : index
    %c0_107 = arith.constant 0 : index
    %243 = vector.load %arg9[%c1_105, %c0_106, %c0_107] : memref<2x1x32xf32, #tpu.memory_space<vmem>>, vector<1x1x32xf32>
    %244 = vector.shape_cast %243 : vector<1x1x32xf32> to vector<1x32xf32>
    %cst_108 = arith.constant dense<0.000000e+00> : vector<8xf32>
    %245 = vector.multi_reduction <add>, %240, %cst_108 [1] : vector<8x32xf32> to vector<8xf32>
    %246 = vector.shape_cast %245 : vector<8xf32> to vector<8x1xf32>
    %cst_109 = arith.constant 3.200000e+01 : f32
    %247 = vector.broadcast %cst_109 : f32 to vector<8x1xf32>
    %248 = arith.divf %246, %247 : vector<8x1xf32>
    %249 = vector.broadcast %248 : vector<8x1xf32> to vector<8x32xf32>
    %250 = arith.subf %240, %249 : vector<8x32xf32>
    %251 = arith.mulf %250, %250 : vector<8x32xf32>
    %cst_110 = arith.constant dense<0.000000e+00> : vector<8xf32>
    %252 = vector.multi_reduction <add>, %251, %cst_110 [1] : vector<8x32xf32> to vector<8xf32>
    %253 = vector.shape_cast %252 : vector<8xf32> to vector<8x1xf32>
    %cst_111 = arith.constant 3.200000e+01 : f32
    %254 = vector.broadcast %cst_111 : f32 to vector<8x1xf32>
    %255 = arith.divf %253, %254 : vector<8x1xf32>
    %cst_112 = arith.constant 9.99999974E-6 : f32
    %256 = vector.broadcast %cst_112 : f32 to vector<8x1xf32>
    %257 = arith.addf %255, %256 : vector<8x1xf32>
    %258 = math.rsqrt %257 : vector<8x1xf32>
    %259 = vector.broadcast %258 : vector<8x1xf32> to vector<8x32xf32>
    %260 = arith.mulf %250, %259 : vector<8x32xf32>
    %261 = vector.broadcast %242 : vector<1x32xf32> to vector<8x32xf32>
    %262 = arith.mulf %260, %261 : vector<8x32xf32>
    %263 = vector.broadcast %244 : vector<1x32xf32> to vector<8x32xf32>
    %264 = arith.addf %262, %263 : vector<8x32xf32>
    %c1_113 = arith.constant 1 : index
    %c0_114 = arith.constant 0 : index
    %c0_115 = arith.constant 0 : index
    %265 = vector.load %arg10[%c1_113, %c0_114, %c0_115] : memref<2x32x32xbf16, #tpu.memory_space<vmem>>, vector<1x32x32xbf16>
    %266 = vector.shape_cast %265 : vector<1x32x32xbf16> to vector<32x32xbf16>
    %267 = arith.truncf %264 : vector<8x32xf32> to vector<8x32xbf16>
    %cst_116 = arith.constant dense<0.000000e+00> : vector<8x32xf32>
    %268 = tpu.matmul %267, %266, %cst_116 {dimension_numbers = #tpu.dot_dimension_numbers<[1], [0], [0], [1], [0, 0, 1, 1], [], []>} : vector<8x32xbf16>, vector<32x32xbf16>, vector<8x32xf32> -> vector<8x32xf32>
    %c1_117 = arith.constant 1 : index
    %c0_118 = arith.constant 0 : index
    %c0_119 = arith.constant 0 : index
    %269 = vector.load %arg11[%c1_117, %c0_118, %c0_119] : memref<2x1x32xf32, #tpu.memory_space<vmem>>, vector<1x1x32xf32>
    %270 = vector.shape_cast %269 : vector<1x1x32xf32> to vector<1x32xf32>
    %271 = vector.broadcast %270 : vector<1x32xf32> to vector<8x32xf32>
    %272 = arith.addf %268, %271 : vector<8x32xf32>
    %cst_120 = arith.constant 0.000000e+00 : f32
    %273 = vector.broadcast %cst_120 : f32 to vector<8x32xf32>
    %274 = arith.maximumf %272, %273 : vector<8x32xf32>
    %c1_121 = arith.constant 1 : index
    %c0_122 = arith.constant 0 : index
    %c0_123 = arith.constant 0 : index
    %275 = vector.load %arg12[%c1_121, %c0_122, %c0_123] : memref<2x32x32xbf16, #tpu.memory_space<vmem>>, vector<1x32x32xbf16>
    %276 = vector.shape_cast %275 : vector<1x32x32xbf16> to vector<32x32xbf16>
    %277 = arith.truncf %274 : vector<8x32xf32> to vector<8x32xbf16>
    %cst_124 = arith.constant dense<0.000000e+00> : vector<8x32xf32>
    %278 = tpu.matmul %277, %276, %cst_124 {dimension_numbers = #tpu.dot_dimension_numbers<[1], [0], [0], [1], [0, 0, 1, 1], [], []>} : vector<8x32xbf16>, vector<32x32xbf16>, vector<8x32xf32> -> vector<8x32xf32>
    %c1_125 = arith.constant 1 : index
    %c0_126 = arith.constant 0 : index
    %c0_127 = arith.constant 0 : index
    %279 = vector.load %arg13[%c1_125, %c0_126, %c0_127] : memref<2x1x32xf32, #tpu.memory_space<vmem>>, vector<1x1x32xf32>
    %280 = vector.shape_cast %279 : vector<1x1x32xf32> to vector<1x32xf32>
    %281 = vector.broadcast %280 : vector<1x32xf32> to vector<8x32xf32>
    %282 = arith.addf %278, %281 : vector<8x32xf32>
    %283 = arith.addf %264, %282 : vector<8x32xf32>
    %c1_128 = arith.constant 1 : index
    %c0_129 = arith.constant 0 : index
    %c0_130 = arith.constant 0 : index
    %284 = vector.load %arg14[%c1_128, %c0_129, %c0_130] : memref<2x1x32xf32, #tpu.memory_space<vmem>>, vector<1x1x32xf32>
    %285 = vector.shape_cast %284 : vector<1x1x32xf32> to vector<1x32xf32>
    %c1_131 = arith.constant 1 : index
    %c0_132 = arith.constant 0 : index
    %c0_133 = arith.constant 0 : index
    %286 = vector.load %arg15[%c1_131, %c0_132, %c0_133] : memref<2x1x32xf32, #tpu.memory_space<vmem>>, vector<1x1x32xf32>
    %287 = vector.shape_cast %286 : vector<1x1x32xf32> to vector<1x32xf32>
    %cst_134 = arith.constant dense<0.000000e+00> : vector<8xf32>
    %288 = vector.multi_reduction <add>, %283, %cst_134 [1] : vector<8x32xf32> to vector<8xf32>
    %289 = vector.shape_cast %288 : vector<8xf32> to vector<8x1xf32>
    %cst_135 = arith.constant 3.200000e+01 : f32
    %290 = vector.broadcast %cst_135 : f32 to vector<8x1xf32>
    %291 = arith.divf %289, %290 : vector<8x1xf32>
    %292 = vector.broadcast %291 : vector<8x1xf32> to vector<8x32xf32>
    %293 = arith.subf %283, %292 : vector<8x32xf32>
    %294 = arith.mulf %293, %293 : vector<8x32xf32>
    %cst_136 = arith.constant dense<0.000000e+00> : vector<8xf32>
    %295 = vector.multi_reduction <add>, %294, %cst_136 [1] : vector<8x32xf32> to vector<8xf32>
    %296 = vector.shape_cast %295 : vector<8xf32> to vector<8x1xf32>
    %cst_137 = arith.constant 3.200000e+01 : f32
    %297 = vector.broadcast %cst_137 : f32 to vector<8x1xf32>
    %298 = arith.divf %296, %297 : vector<8x1xf32>
    %cst_138 = arith.constant 9.99999974E-6 : f32
    %299 = vector.broadcast %cst_138 : f32 to vector<8x1xf32>
    %300 = arith.addf %298, %299 : vector<8x1xf32>
    %301 = math.rsqrt %300 : vector<8x1xf32>
    %302 = vector.broadcast %301 : vector<8x1xf32> to vector<8x32xf32>
    %303 = arith.mulf %293, %302 : vector<8x32xf32>
    %304 = vector.broadcast %285 : vector<1x32xf32> to vector<8x32xf32>
    %305 = arith.mulf %303, %304 : vector<8x32xf32>
    %306 = vector.broadcast %287 : vector<1x32xf32> to vector<8x32xf32>
    %307 = arith.addf %305, %306 : vector<8x32xf32>
    %308 = vector.extract_strided_slice %307 {offsets = [0, 0], sizes = [1, 32], strides = [1, 1]} : vector<8x32xf32> to vector<1x32xf32>
    %309 = vector.extract_strided_slice %307 {offsets = [1, 0], sizes = [1, 32], strides = [1, 1]} : vector<8x32xf32> to vector<1x32xf32>
    %310 = vector.extract_strided_slice %307 {offsets = [2, 0], sizes = [1, 32], strides = [1, 1]} : vector<8x32xf32> to vector<1x32xf32>
    %311 = vector.extract_strided_slice %307 {offsets = [3, 0], sizes = [1, 32], strides = [1, 1]} : vector<8x32xf32> to vector<1x32xf32>
    %312 = vector.extract_strided_slice %307 {offsets = [4, 0], sizes = [1, 32], strides = [1, 1]} : vector<8x32xf32> to vector<1x32xf32>
    %313 = vector.extract_strided_slice %307 {offsets = [5, 0], sizes = [1, 32], strides = [1, 1]} : vector<8x32xf32> to vector<1x32xf32>
    %314 = vector.extract_strided_slice %307 {offsets = [6, 0], sizes = [1, 32], strides = [1, 1]} : vector<8x32xf32> to vector<1x32xf32>
    %315 = vector.extract_strided_slice %307 {offsets = [7, 0], sizes = [1, 32], strides = [1, 1]} : vector<8x32xf32> to vector<1x32xf32>
    %316 = tpu.concatenate %308, %309, %310, %311, %312, %313, %314, %315 in 1 : vector<1x32xf32>, vector<1x32xf32>, vector<1x32xf32>, vector<1x32xf32>, vector<1x32xf32>, vector<1x32xf32>, vector<1x32xf32>, vector<1x32xf32> -> vector<1x256xf32>
    %c0_139 = arith.constant 0 : index
    %c0_140 = arith.constant 0 : index
    %317 = vector.load %arg16[%c0_139, %c0_140] : memref<256x32xbf16, #tpu.memory_space<vmem>>, vector<256x32xbf16>
    %318 = arith.truncf %316 : vector<1x256xf32> to vector<1x256xbf16>
    %cst_141 = arith.constant dense<0.000000e+00> : vector<1x32xf32>
    %319 = tpu.matmul %318, %317, %cst_141 {dimension_numbers = #tpu.dot_dimension_numbers<[1], [0], [0], [1], [0, 0, 1, 1], [], []>} : vector<1x256xbf16>, vector<256x32xbf16>, vector<1x32xf32> -> vector<1x32xf32>
    %c0_142 = arith.constant 0 : index
    %c0_143 = arith.constant 0 : index
    %320 = vector.load %arg17[%c0_142, %c0_143] : memref<1x32xf32, #tpu.memory_space<vmem>>, vector<1x32xf32>
    %321 = arith.addf %319, %320 : vector<1x32xf32>
    %c0_144 = arith.constant 0 : index
    %c0_145 = arith.constant 0 : index
    %322 = vector.load %arg18[%c0_144, %c0_145] : memref<1x32xf32, #tpu.memory_space<vmem>>, vector<1x32xf32>
    %c0_146 = arith.constant 0 : index
    %c0_147 = arith.constant 0 : index
    %323 = vector.load %arg19[%c0_146, %c0_147] : memref<1x32xf32, #tpu.memory_space<vmem>>, vector<1x32xf32>
    %cst_148 = arith.constant dense<0.000000e+00> : vector<1xf32>
    %324 = vector.multi_reduction <add>, %321, %cst_148 [1] : vector<1x32xf32> to vector<1xf32>
    %325 = vector.shape_cast %324 : vector<1xf32> to vector<1x1xf32>
    %cst_149 = arith.constant 3.200000e+01 : f32
    %326 = vector.broadcast %cst_149 : f32 to vector<1x1xf32>
    %327 = arith.divf %325, %326 : vector<1x1xf32>
    %328 = vector.broadcast %327 : vector<1x1xf32> to vector<1x32xf32>
    %329 = arith.subf %321, %328 : vector<1x32xf32>
    %330 = arith.mulf %329, %329 : vector<1x32xf32>
    %cst_150 = arith.constant dense<0.000000e+00> : vector<1xf32>
    %331 = vector.multi_reduction <add>, %330, %cst_150 [1] : vector<1x32xf32> to vector<1xf32>
    %332 = vector.shape_cast %331 : vector<1xf32> to vector<1x1xf32>
    %cst_151 = arith.constant 3.200000e+01 : f32
    %333 = vector.broadcast %cst_151 : f32 to vector<1x1xf32>
    %334 = arith.divf %332, %333 : vector<1x1xf32>
    %cst_152 = arith.constant 9.99999974E-6 : f32
    %335 = vector.broadcast %cst_152 : f32 to vector<1x1xf32>
    %336 = arith.addf %334, %335 : vector<1x1xf32>
    %337 = math.rsqrt %336 : vector<1x1xf32>
    %338 = vector.broadcast %337 : vector<1x1xf32> to vector<1x32xf32>
    %339 = arith.mulf %329, %338 : vector<1x32xf32>
    %340 = arith.mulf %339, %322 : vector<1x32xf32>
    %341 = arith.addf %340, %323 : vector<1x32xf32>
    %c0_153 = arith.constant 0 : index
    %c0_154 = arith.constant 0 : index
    %c0_155 = arith.constant 0 : index
    %342 = vector.load %arg20[%c0_153, %c0_154, %c0_155] : memref<1x1x32xf32, #tpu.memory_space<vmem>>, vector<1x1x32xf32>
    %343 = vector.shape_cast %342 : vector<1x1x32xf32> to vector<1x32xf32>
    %344 = vector.shape_cast %341 : vector<1x32xf32> to vector<1x1x32xf32>
    tpu.vector_store %arg20[%c0_153, %c0_154, %c0_155], %344 {strides = array<i32>} : memref<1x1x32xf32, #tpu.memory_space<vmem>>, vector<1x1x32xf32>,
    return
  }
  func.func @transform_0(%arg0: i32) -> (i32, i32, i32) {
    %c0_i32 = arith.constant 0 : i32
    %c0_i32_0 = arith.constant 0 : i32
    %c0_i32_1 = arith.constant 0 : i32
    return %arg0, %c0_i32, %c0_i32_0 : i32, i32, i32
  }
  func.func @transform_1(%arg0: i32) -> (i32, i32) {
    %c0_i32 = arith.constant 0 : i32
    %c0_i32_0 = arith.constant 0 : i32
    %c0_i32_1 = arith.constant 0 : i32
    return %c0_i32, %c0_i32_0 : i32, i32
  }
  func.func @transform_2(%arg0: i32) -> (i32, i32) {
    %c0_i32 = arith.constant 0 : i32
    %c0_i32_0 = arith.constant 0 : i32
    %c0_i32_1 = arith.constant 0 : i32
    return %c0_i32, %c0_i32_0 : i32, i32
  }
  func.func @transform_3(%arg0: i32) -> (i32, i32, i32) {
    %c0_i32 = arith.constant 0 : i32
    %c0_i32_0 = arith.constant 0 : i32
    %c0_i32_1 = arith.constant 0 : i32
    %c0_i32_2 = arith.constant 0 : i32
    return %c0_i32, %c0_i32_0, %c0_i32_1 : i32, i32, i32
  }
  func.func @transform_4(%arg0: i32) -> (i32, i32, i32) {
    %c0_i32 = arith.constant 0 : i32
    %c0_i32_0 = arith.constant 0 : i32
    %c0_i32_1 = arith.constant 0 : i32
    %c0_i32_2 = arith.constant 0 : i32
    return %c0_i32, %c0_i32_0, %c0_i32_1 : i32, i32, i32
  }
  func.func @transform_5(%arg0: i32) -> (i32, i32, i32) {
    %c0_i32 = arith.constant 0 : i32
    %c0_i32_0 = arith.constant 0 : i32
    %c0_i32_1 = arith.constant 0 : i32
    %c0_i32_2 = arith.constant 0 : i32
    return %c0_i32, %c0_i32_0, %c0_i32_1 : i32, i32, i32
  }
  func.func @transform_6(%arg0: i32) -> (i32, i32, i32) {
    %c0_i32 = arith.constant 0 : i32
    %c0_i32_0 = arith.constant 0 : i32
    %c0_i32_1 = arith.constant 0 : i32
    %c0_i32_2 = arith.constant 0 : i32
    return %c0_i32, %c0_i32_0, %c0_i32_1 : i32, i32, i32
  }
  func.func @transform_7(%arg0: i32) -> (i32, i32, i32) {
    %c0_i32 = arith.constant 0 : i32
    %c0_i32_0 = arith.constant 0 : i32
    %c0_i32_1 = arith.constant 0 : i32
    %c0_i32_2 = arith.constant 0 : i32
    return %c0_i32, %c0_i32_0, %c0_i32_1 : i32, i32, i32
  }
  func.func @transform_8(%arg0: i32) -> (i32, i32, i32) {
    %c0_i32 = arith.constant 0 : i32
    %c0_i32_0 = arith.constant 0 : i32
    %c0_i32_1 = arith.constant 0 : i32
    %c0_i32_2 = arith.constant 0 : i32
    return %c0_i32, %c0_i32_0, %c0_i32_1 : i32, i32, i32
  }
  func.func @transform_9(%arg0: i32) -> (i32, i32, i32) {
    %c0_i32 = arith.constant 0 : i32
    %c0_i32_0 = arith.constant 0 : i32
    %c0_i32_1 = arith.constant 0 : i32
    %c0_i32_2 = arith.constant 0 : i32
    return %c0_i32, %c0_i32_0, %c0_i32_1 : i32, i32, i32
  }
  func.func @transform_10(%arg0: i32) -> (i32, i32, i32) {
    %c0_i32 = arith.constant 0 : i32
    %c0_i32_0 = arith.constant 0 : i32
    %c0_i32_1 = arith.constant 0 : i32
    %c0_i32_2 = arith.constant 0 : i32
    return %c0_i32, %c0_i32_0, %c0_i32_1 : i32, i32, i32
  }
  func.func @transform_11(%arg0: i32) -> (i32, i32, i32) {
    %c0_i32 = arith.constant 0 : i32
    %c0_i32_0 = arith.constant 0 : i32
    %c0_i32_1 = arith.constant 0 : i32
    %c0_i32_2 = arith.constant 0 : i32
    return %c0_i32, %c0_i32_0, %c0_i32_1 : i32, i32, i32
  }
  func.func @transform_12(%arg0: i32) -> (i32, i32, i32) {
    %c0_i32 = arith.constant 0 : i32
    %c0_i32_0 = arith.constant 0 : i32
    %c0_i32_1 = arith.constant 0 : i32
    %c0_i32_2 = arith.constant 0 : i32
    return %c0_i32, %c0_i32_0, %c0_i32_1 : i32, i32, i32
  }
  func.func @transform_13(%arg0: i32) -> (i32, i32, i32) {
    %c0_i32 = arith.constant 0 : i32
    %c0_i32_0 = arith.constant 0 : i32
    %c0_i32_1 = arith.constant 0 : i32
    %c0_i32_2 = arith.constant 0 : i32
    return %c0_i32, %c0_i32_0, %c0_i32_1 : i32, i32, i32
  }
  func.func @transform_14(%arg0: i32) -> (i32, i32, i32) {
    %c0_i32 = arith.constant 0 : i32
    %c0_i32_0 = arith.constant 0 : i32
    %c0_i32_1 = arith.constant 0 : i32
    %c0_i32_2 = arith.constant 0 : i32
    return %c0_i32, %c0_i32_0, %c0_i32_1 : i32, i32, i32
  }
  func.func @transform_15(%arg0: i32) -> (i32, i32) {
    %c0_i32 = arith.constant 0 : i32
    %c0_i32_0 = arith.constant 0 : i32
    %c0_i32_1 = arith.constant 0 : i32
    return %c0_i32, %c0_i32_0 : i32, i32
  }
  func.func @transform_16(%arg0: i32) -> (i32, i32) {
    %c0_i32 = arith.constant 0 : i32
    %c0_i32_0 = arith.constant 0 : i32
    %c0_i32_1 = arith.constant 0 : i32
    return %c0_i32, %c0_i32_0 : i32, i32
  }
  func.func @transform_17(%arg0: i32) -> (i32, i32) {
    %c0_i32 = arith.constant 0 : i32
    %c0_i32_0 = arith.constant 0 : i32
    %c0_i32_1 = arith.constant 0 : i32
    return %c0_i32, %c0_i32_0 : i32, i32
  }
  func.func @transform_18(%arg0: i32) -> (i32, i32) {
    %c0_i32 = arith.constant 0 : i32
    %c0_i32_0 = arith.constant 0 : i32
    %c0_i32_1 = arith.constant 0 : i32
    return %c0_i32, %c0_i32_0 : i32, i32
  }
  func.func @transform_19(%arg0: i32) -> (i32, i32, i32) {
    %c0_i32 = arith.constant 0 : i32
    %c0_i32_0 = arith.constant 0 : i32
    %c0_i32_1 = arith.constant 0 : i32
    return %arg0, %c0_i32, %c0_i32_0 : i32, i32, i32
  }
}

</mosaic_0001>

<bundles_post_ra>
// kernel: tpu_custom_call.1
= control target key start
LH: loop header
LB: loop body
LE: loop exit
PB: predicated region body
PF: predicated region fallthrough
CT: control target
= control target key end

     0   :  { %s3704_s0 = inlined_call_operand.vmem [shape: f32[2,8,16], index: 0, kind: input, shape index: {}]   ;;  %s3705_s1 = inlined_call_operand.vmem [shape: bf16[16,32], index: 1, kind: input, shape index: {}]   ;;  %s3706_s2 = inlined_call_operand.vmem [shape: f32[1,32], index: 2, kind: input, shape index: {}]   ;;  %s3707_s3 = inlined_call_operand.vmem [shape: bf16[2,32,96], index: 3, kind: input, shape index: {}]   ;;  %s3708_s4 = inlined_call_operand.vmem [shape: f32[2,1,96], index: 4, kind: input, shape index: {}]   ;;  %s3709_s5 = inlined_call_operand.vmem [shape: bf16[2,32,32], index: 5, kind: input, shape index: {}]   ;;  %s3710_s6 = inlined_call_operand.vmem [shape: f32[2,1,32], index: 6, kind: input, shape index: {}]   ;;  %s3711_s7 = inlined_call_operand.vmem [shape: f32[2,1,32], index: 7, kind: input, shape index: {}]   ;;  %s3712_s8 = inlined_call_operand.vmem [shape: f32[2,1,32], index: 8, kind: input, shape index: {}]   ;;  %s3713_s9 = inlined_call_operand.vmem [shape: bf16[2,32,32], index: 9, kind: input, shape index: {}]   ;;  %s3714_s10 = inlined_call_operand.vmem [shape: f32[2,1,32], index: 10, kind: input, shape index: {}]   ;;  %s3715_s11 = inlined_call_operand.vmem [shape: bf16[2,32,32], index: 11, kind: input, shape index: {}]   ;;  %s3716_s12 = inlined_call_operand.vmem [shape: f32[2,1,32], index: 12, kind: input, shape index: {}]   ;;  %s3717_s13 = inlined_call_operand.vmem [shape: f32[2,1,32], index: 13, kind: input, shape index: {}]   ;;  %s3718_s14 = inlined_call_operand.vmem [shape: f32[2,1,32], index: 14, kind: input, shape index: {}]   ;;  %s3719_s15 = inlined_call_operand.vmem [shape: bf16[256,32], index: 15, kind: input, shape index: {}]   ;;  %s3720_s16 = inlined_call_operand.vmem [shape: f32[1,32], index: 16, kind: input, shape index: {}]   ;;  %s3721_s17 = inlined_call_operand.vmem [shape: f32[1,32], index: 17, kind: input, shape index: {}]   ;;  %s3722_s18 = inlined_call_operand.vmem [shape: f32[1,32], index: 18, kind: input, shape index: {}]   ;;  %s3723_s19 = inlined_call_operand.hbm [shape: f32[2,1,32], index: 19, kind: output, shape index: {}]  }
   0x1   :  { %3742 = sst [smem:[#allocation9_spill]] %s3704_s0 }
   0x2   :  { %3743 = sst [smem:[#allocation10_spill]] %s3705_s1 }
   0x3   :  { %3744 = sst [smem:[#allocation11_spill]] %s3706_s2 }
   0x4   :  { %3745 = sst [smem:[#allocation12_spill]] %s3707_s3 }
   0x5   :  { %3746 = sst [smem:[#allocation13_spill]] %s3708_s4 }
   0x6   :  { %3747 = sst [smem:[#allocation14_spill]] %s3709_s5 }
   0x7   :  { %24 = vsyncpa [#allocation3], 0 }
   0x8   :  { %26 = vsyncpa [#allocation3 + $0x1], 0  ;;  %s3218_s0 = smov 0   ;;  %s3220_s30 = smov 0  }
   0x9   :  { %s3222_s20 = smov 0   ;;  %s3224_s21 = smov 0  }
   0xa LB: > { %3748 = sst [smem:[#allocation5_spill]] %s3094_s20  ;;  %s3239_s1 = sadd.s32 4294967295, %s3098_s21   ;;  %s3098_s21 = sphi %s3224_s21, %s3773_s21   ;;  %s3094_s20 = sphi %s3222_s20, %s3775_s20   ;;  %s3090_s30 = sphi %s3220_s30, %s3777_s30   ;;  %s3086_s0 = sphi %s3218_s0, %s3776_s0  }
   0xb   : > { %s2537_s22 = sadd.s32 4294967294, %s3098_s21   ;;  %s3243_s2 = sadd.s32 1, %s3098_s21  }
   0xc   : > { %3749 = sst [smem:[#allocation6_spill]] %s3243_s2  ;;  %s443_s23 = sadd.s32 1, %s3094_s20 }
   0xd   : > { %s440_s24 = ssub.s32 %s3098_s21, %s3243_s2  ;;  %p453_p0 = scmp.ne.s32.totalorder %s3094_s20, %s3090_s30 }
   0xe   : > { %p441_p1 = scmp.eq.s32.totalorder %s440_s24, 0  ;;  %p454_p2 = scmp.eq.s32.totalorder %s3239_s1, 1 }
   0xf   : > { %p459_p3 = scmp.ne.s32.totalorder %s3090_s30, %s3086_s0  ;;  %p460_p4 = scmp.eq.s32.totalorder %s2537_s22, 1 }
  0x10   : > { %s3254_s25 = scalar_select %p441_p1, %s3094_s20, %s443_s23  }
  0x11   : > { %p3256_p5 = por %p454_p2, %p453_p0  ;;  %p3260_p6 = por %p460_p4, %p459_p3 }
  0x12   : > { %3750 = sst [smem:[#allocation7_spill]] %s3254_s25  ;;  %p2540_p7 = scmp.ge.s32.totalorder %s3098_s21, 1 }
  0x13   : > { %s3752_s26 = scalar_select %p3260_p6, 1, 0 }
  0x14   : > { %p539_p8 = scmp.lt.s32.totalorder %s3098_s21, 3 }
  0x15   : > { %3753 = sst [smem:[#allocation8_spill]] %s3752_s26 }
  0x16   : > { %p540_p9 = pnand %p2540_p7, %p539_p8 }
  0x17   : > { %s3754_s29 = sld [smem:[#allocation10_spill]] (!%p540_p9)  ;;  %v3100_v1 = vmov (!%p540_p9), 0.0   ;;  %p593_p10 = scmp.lt.s32.totalorder (!%p540_p9), %s3239_s1, 1  ;;  %vm3101_vm0 = vmmov (!%p540_p9), 0   ;;  %vm615_vm1 = vcmask (!%p540_p9), 130048   ;;  %vm683_vm2 = vcmask (!%p540_p9), 261120  }
  0x18   : > { %543 = sbr.rel (%p540_p9) target bundleno = 6003 (0x1773), region = 96  ;;  %2724 = vmatprep.subr.bf16.mxu0 (!%p540_p9), %v3100_v1  ;;  %2744 = vmatprep.subr.bf16.mxu1 (!%p540_p9), %v3100_v1  ;;  %s3755_s28 = sld [smem:[#allocation12_spill]] (!%p540_p9)  ;;  %vm731_vm3 = vcmask (!%p540_p9), 64512   ;;  %vm795_vm4 = vcmask (!%p540_p9), 1043456   ;;  %vm1183_vm5 = vcmask (!%p540_p9), 195584   ;;  %vm2272_vm6 = vcmask (!%p540_p9), 523264  }
  0x19   : > { %2726 = vmatprep.mubr.msk.bf16.mxu0 (!%p540_p9), %vm3101_vm0, %v3100_v1  ;;  %2746 = vmatprep.mubr.msk.bf16.mxu1 (!%p540_p9), %vm3101_vm0, %v3100_v1  ;;  %s3756_s20 = sld [smem:[#allocation9_spill]] (!%p540_p9)  ;;  %s3758_s4 = sld [smem:[#allocation13_spill]] (!%p540_p9)  ;;  %vm2274_vm7 = vcmask (!%p540_p9), 785408   ;;  %vm2452_vm8 = vcmask (!%p540_p9), 253952  }
  0x1a   : > { %s3737_s24 = smov (!%p540_p9), 120   ;;  %s3741_s27 = smov (!%p540_p9), 96  }
  0x1b   : > { %s3729_s25 = smov (!%p540_p9), 72   ;;  %s3735_s26 = smov (!%p540_p9), 56  }
  0x1c   : > { %s3759_s5 = sld [smem:[#allocation14_spill]] (!%p540_p9) }
  0x1d   : > { %v2961_v0 = vld [vmem:[%s3754_s29] sm:$0xff] (!%p540_p9)   ;;  %s3730_s29 = smov (!%p540_p9), 80  }
  0x1e   : > { %2725 = vmatpush3.bf16.msra.mxu0 (!%p540_p9), %v2961_v0  ;;  %v2962_v2 = vld [vmem:[%s3755_s28] sm:$0xff] (!%p540_p9)   ;;  %v2963_v5 = vld [vmem:[%s3755_s28 + $0x8] sm:$0xff] (!%p540_p9)  }
  0x1f   : > { %s594_s22 = scalar_select %p593_p10, %s3239_s1, 1  ;;  %2730 = vmatprep.subr.bf16.mxu0 %v3100_v1  ;;  %v2545_v13 = vld [vmem:[%s3758_s4] ss:$0 sm:$0xff] }
  0x21   : > { %s2541_s23 = sshll.u32 %s594_s22, 3  ;;  %s3105_s22 = smov 88  }
  0x22   : > { %s596_s2 = scalar_lea.vmem %s3756_s20, %s2541_s23  ;;  %s3107_s20 = smov 112  }
  0x23   : > { %v598_v3 = vld [vmem:[%s596_s2] sm:$0xff]  ;;  %s3757_s2 = sld [smem:[#allocation11_spill]]  ;;  %s3733_s23 = smov 64  }
  0x24   : > { %v601_v4 = vpack.c.bf16 %v598_v3, %v598_v3 }
  0x26   : > { %2727 = vmatmul.mubr.msk.bf16.vlgmr.msra.gmra.mrb[0].mxu0 %vm615_vm1, %v601_v4 }
  0x27   : > { %2731 = vmatpush3.bf16.msra.mxu0 %v2962_v2  ;;  %2734 = vmatprep.mubr.msk.bf16.mxu0 %vm3101_vm0, %v3100_v1 }
  0x28   : > { %2732 = vmatprep.subr.bf16.mxu0 %v3100_v1 }
  0x29   : > { %v2542_v6 = vld [vmem:[%s3757_s2] ss:$0 sm:$0xff]  ;;  %s3736_s2 = smov 104  }
  0x2b   : > { %2733 = vmatpush3.bf16.msra.mxu0 %v2963_v5 }
  0x2c   : > { %2738 = vmatprep.subr.bf16.mxu0 %v3100_v1 }
  0xf9   : > { %v653_v7 = vpop.f32.mrb[0].mxu0 }
  0xfa   : > { %v3295_v8 = vadd.f32 %v2542_v6, %v653_v7  ;;  %v2728_v9 = vpop.f32.mrb[1].mxu0 }
  0xfb   : > { %v656_v10 = vpop.f32.mrb[2].mxu0 }
  0xfc   : > { %v663_v11 = vpack.c.bf16 %v3295_v8, %v3295_v8  ;;  %v2729_v12 = vpop.f32.mrb[3].mxu0 }
  0xfe   : > { %2735 = vmatmul.mubr.msk.bf16.vlgmr.msra.gmra.mrb[4].mxu0 %vm683_vm2, %v663_v11 }
  0xff   : > { %2740 = vmatprep.mubr.msk.bf16.mxu0 %vm3101_vm0, %v3100_v1 }
 0x1d1   : > { %v721_v14 = vpop.f32.mrb[4].mxu0 }
 0x1d2   : > { %v722_v15 = vadd.f32 %v2545_v13, %v721_v14  ;;  %v2736_v16 = vpop.f32.mrb[5].mxu0 }
 0x1d3   : > { %v724_v17 = vpop.f32.mrb[6].mxu0 }
 0x1d4   : > { %v3305_v18 = vpack.c.bf16 %v722_v15, %v722_v15  ;;  %v2737_v19 = vpop.f32.mrb[7].mxu0 }
 0x1d6   : > { %839 = vrot.lane.b32.xlu1 %v3305_v18, %s3737_s24  ;;  %729 = vrot.lane.b32.xlu0 %v3305_v18, %s3741_s27  ;;  %s3739_s24 = smov 16  }
 0x1da   : > { %951 = vrot.lane.b32.xlu1 %v3305_v18, %s3730_s29  ;;  %841 = vrot.lane.b32.xlu0 %v3305_v18, %s3105_s22  ;;  %s3731_s29 = smov 48  }
 0x1de   : > { %1061 = vrot.lane.b32.xlu1 %v3305_v18, %s3729_s25  ;;  %949 = vrot.lane.b32.xlu0 %v3305_v18, %s3107_s20  ;;  %s3732_s25 = smov 40  }
 0x1e2   : > { %1059 = vrot.lane.b32.xlu0 %v3305_v18, %s3736_s2  ;;  %s3767_s2 = smov 48  }
 0x248   : > { %v730_v20 = vpop.permute.xlu0 %729  ;;  %v840_v23 = vpop.permute.xlu1 %839 }
 0x249   : > { %v736_v21 = vsel %vm731_vm3, %v730_v20, 0 }
 0x24a   : > { %2739 = vmatpush3.bf16.xpose.msra.mxu0 %v736_v21 }
 0x24b   : > { %2750 = vmatprep.subr.bf16.mxu0 %v3100_v1 }
 0x24c   : > { %v842_v22 = vpop.permute.xlu0 %841  ;;  %v952_v25 = vpop.permute.xlu1 %951 }
 0x24d   : > { %v847_v24 = vsel %vm731_vm3, %v842_v22, 0  ;;  %v957_v26 = vsel %vm731_vm3, %v952_v25, 0 }
 0x250   : > { %v1062_v27 = vpop.permute.xlu1 %1061  ;;  %v950_v28 = vpop.permute.xlu0 %949 }
 0x251   : > { %2741 = vmatmul.mubr.msk.bf16.vlgmr.msra.gmra.mrb[8].mxu0 %vm731_vm3, %v3305_v18  ;;  %v1067_v29 = vsel %vm731_vm3, %v1062_v27, 0 }
 0x252   : > { %2751 = vmatpush3.bf16.xpose.msra.mxu0 %v847_v24  ;;  %2752 = vmatprep.mubr.msk.bf16.mxu0 %vm3101_vm0, %v3100_v1 }
 0x253   : > { %2762 = vmatprep.subr.bf16.mxu0 %v3100_v1 }
 0x254   : > { %v1060_v30 = vpop.permute.xlu0 %1059 }
 0x259   : > { %2753 = vmatmul.mubr.msk.bf16.vlgmr.msra.gmra.mrb[12].mxu0 %vm731_vm3, %v840_v23 }
 0x25a   : > { %2763 = vmatpush3.bf16.xpose.msra.mxu0 %v957_v26  ;;  %2764 = vmatprep.mubr.msk.bf16.mxu0 %vm3101_vm0, %v3100_v1 }
 0x25b   : > { %2774 = vmatprep.subr.bf16.mxu0 %v3100_v1 }
 0x261   : > { %2765 = vmatmul.mubr.msk.bf16.vlgmr.msra.gmra.mrb[16].mxu0 %vm731_vm3, %v950_v28 }
 0x262   : > { %2775 = vmatpush3.bf16.xpose.msra.mxu0 %v1067_v29  ;;  %2776 = vmatprep.mubr.msk.bf16.mxu0 %vm3101_vm0, %v3100_v1 }
 0x263   : > { %2786 = vmatprep.subr.bf16.mxu0 %v3100_v1 }
 0x269   : > { %2777 = vmatmul.mubr.msk.bf16.vlgmr.msra.gmra.mrb[20].mxu0 %vm731_vm3, %v1060_v30 }
 0x26a   : > { %2790 = vmatprep.mubr.msk.bf16.mxu0 %vm3101_vm0, %v3100_v1 }
 0x324   : > { %v772_v31 = vpop.f32.mrb[8].mxu0 }
 0x325   : > { %v2742_v32 = vpop.f32.mrb[9].mxu0  ;;  %v778_v33 = vsel %vm731_vm3, %v772_v31, -inf }
 0x326   : > { %779 = vmax.xlane.f32.xlu1 %v778_v33  ;;  %v775_v34 = vpop.f32.mrb[10].mxu0 }
 0x327   : > { %v2743_v35 = vpop.f32.mrb[11].mxu0 }
 0x32c   : > { %v883_v36 = vpop.f32.mrb[12].mxu0 }
 0x32d   : > { %v2754_v37 = vpop.f32.mrb[13].mxu0  ;;  %v889_v38 = vsel %vm731_vm3, %v883_v36, -inf }
 0x32e   : > { %890 = vmax.xlane.f32.xlu0 %v889_v38  ;;  %v886_v39 = vpop.f32.mrb[14].mxu0 }
 0x32f   : > { %v2755_v40 = vpop.f32.mrb[15].mxu0 }
 0x334   : > { %v993_v41 = vpop.f32.mrb[16].mxu0 }
 0x335   : > { %v2766_v42 = vpop.f32.mrb[17].mxu0  ;;  %v999_v43 = vsel %vm731_vm3, %v993_v41, -inf }
 0x336   : > { %1000 = vmax.xlane.f32.xlu0 %v999_v43  ;;  %v996_v44 = vpop.f32.mrb[18].mxu0  ;;  %v2965_v42 = vld [vmem:[%s3759_s5 + $0x8] sm:$0xff]  }
 0x337   : > { %v2767_v45 = vpop.f32.mrb[19].mxu0 }
 0x33c   : > { %v1103_v46 = vpop.f32.mrb[20].mxu0 }
 0x33d   : > { %v2778_v47 = vpop.f32.mrb[21].mxu0  ;;  %v1109_v48 = vsel %vm731_vm3, %v1103_v46, -inf }
 0x33e   : > { %1110 = vmax.xlane.f32.xlu1 %v1109_v48  ;;  %v1106_v49 = vpop.f32.mrb[22].mxu0 }
 0x33f   : > { %v2779_v50 = vpop.f32.mrb[23].mxu0 }
 0x3b3   : > { %v780_v51 = vpop.xlane.xlu1 %779 }
 0x3b4   : > { %v781_v52 = vsub.f32 %v772_v31, %v780_v51 }
 0x3b6   : > { %v782_v53 = vmul.f32 1.442695, %v781_v52 }
 0x3b8   : > { %2994 = vpow2.f32 %v782_v53 }
 0x3bb   : > { %v891_v54 = vpop.xlane.xlu0 %890 }
 0x3bc   : > { %v892_v55 = vsub.f32 %v883_v36, %v891_v54 }
 0x3be   : > { %v893_v56 = vmul.f32 1.442695, %v892_v55 }
 0x3c0   : > { %2996 = vpow2.f32 %v893_v56 }
 0x3c2   : > { %v2995_v57 = vpop.eup %2994 }
 0x3c3   : > { %v1001_v58 = vpop.xlane.xlu0 %1000  ;;  %v784_v59 = vsel %vm731_vm3, %v2995_v57, 0.0 }
 0x3c4   : > { %v1002_v60 = vsub.f32 %v993_v41, %v1001_v58  ;;  %785 = vadd.xlane.f32.xlu0 %v784_v59  ;;  %v2964_v41 = vld [vmem:[%s3759_s5] sm:$0xff]  }
 0x3c5   : > { %2787 = vmatpush3.bf16.msra.mxu0 %v2964_v41  ;;  %v2557_v58 = vld [vmem:[%s3710_s6] ss:$0 sm:$0xff] }
 0x3c6   : > { %v1003_v61 = vmul.f32 1.442695, %v1002_v60  ;;  %2788 = vmatprep.subr.bf16.mxu0 %v3100_v1 }
 0x3c8   : > { %2998 = vpow2.f32 %v1003_v61 }
 0x3c9   : > { %2789 = vmatpush3.bf16.msra.mxu0 %v2965_v42 }
 0x3ca   : > { %v2997_v62 = vpop.eup %2996  ;;  %2802 = vmatprep.subr.bf16.mxu0 %v3100_v1 }
 0x3cb   : > { %v895_v63 = vsel %vm731_vm3, %v2997_v62, 0.0  ;;  %v1111_v3 = vpop.xlane.xlu1 %1110 }
 0x3cc   : > { %896 = vadd.xlane.f32.xlu1 %v895_v63  ;;  %v1112_v4 = vsub.f32 %v1103_v46, %v1111_v3 }
 0x3ce   : > { %v1113_v5 = vmul.f32 1.442695, %v1112_v4 }
 0x3d0   : > { %3000 = vpow2.f32 %v1113_v5 }
 0x3d2   : > { %v2999_v0 = vpop.eup %2998 }
 0x3d3   : > { %v1005_v2 = vsel %vm731_vm3, %v2999_v0, 0.0 }
 0x3d4   : > { %1006 = vadd.xlane.f32.xlu0 %v1005_v2 }
 0x3da   : > { %v3001_v6 = vpop.eup %3000 }
 0x3db   : > { %v1115_v7 = vsel %vm731_vm3, %v3001_v6, 0.0 }
 0x3dd   : > { %901 = vrot.lane.b32.xlu1 %v3305_v18, %s3735_s26  ;;  %s3761_s26 = smov 104  }
 0x3ea   : > { %790 = vrot.lane.b32.xlu0 %v3305_v18, %s3733_s23  ;;  %s3766_s23 = smov 40  }
 0x3ee   : > { %1121 = vrot.lane.b32.xlu0 %v3305_v18, %s3732_s25  ;;  %s3738_s25 = smov 24  }
 0x401   : > { %1116 = vadd.xlane.f32.xlu1 %v1115_v7 }
 0x412   : > { %1011 = vrot.lane.b32.xlu1 %v3305_v18, %s3731_s29  ;;  %s3740_s29 = smov 8  }
 0x451   : > { %v786_v9 = vpop.xlane.xlu0 %785 }
 0x452   : > { %3002 = vrcp.f32 %v786_v9  ;;  %v2966_v9 = vld [vmem:[%s3713_s9] sm:$0xff]  }
 0x459   : > { %v897_v10 = vpop.xlane.xlu1 %896 }
 0x45a   : > { %3004 = vrcp.f32 %v897_v10 }
 0x45c   : > { %v3003_v11 = vpop.eup %3002 }
 0x45d   : > { %v788_v13 = vmul.f32 %v3003_v11, %v2995_v57  ;;  %v902_v16 = vpop.permute.xlu1 %901 }
 0x45e   : > { %v907_v20 = vsel %vm795_vm4, %v902_v16, 0  ;;  %v2562_v16 = vld [vmem:[%s3712_s8] ss:$0 sm:$0xff] }
 0x45f   : > { %v789_v17 = vpack.c.bf16 %v788_v13, %v788_v13 }
 0x461   : > { %v1007_v12 = vpop.xlane.xlu0 %1006 }
 0x462   : > { %3006 = vrcp.f32 %v1007_v12 }
 0x464   : > { %v3005_v19 = vpop.eup %3004 }
 0x465   : > { %v791_v14 = vpop.permute.xlu0 %790  ;;  %v899_v18 = vmul.f32 %v3005_v19, %v2997_v62 }
 0x466   : > { %v797_v15 = vsel %vm795_vm4, %v791_v14, 0  ;;  %v2561_v14 = vld [vmem:[%s3711_s7] ss:$0 sm:$0xff] }
 0x467   : > { %2745 = vmatpush3.bf16.msra.mxu1 %v797_v15  ;;  %v900_v21 = vpack.c.bf16 %v899_v18, %v899_v18  ;;  %v2968_v18 = vld [vmem:[%s3715_s11] sm:$0xff]  }
 0x468   : > { %2756 = vmatprep.subr.bf16.mxu1 %v3100_v1 }
 0x469   : > { %v1122_v27 = vpop.permute.xlu0 %1121 }
 0x46a   : > { %2747 = vmatmul.mubr.msk.bf16.vlgmr.msra.gmra.mrb[0].mxu1 %vm731_vm3, %v789_v17  ;;  %v1127_v29 = vsel %vm795_vm4, %v1122_v27, 0 }
 0x46b   : > { %2757 = vmatpush3.bf16.msra.mxu1 %v907_v20  ;;  %2758 = vmatprep.mubr.msk.bf16.mxu1 %vm3101_vm0, %v3100_v1 }
 0x46c   : > { %2768 = vmatprep.subr.bf16.mxu1 %v3100_v1  ;;  %v3007_v22 = vpop.eup %3006 }
 0x46d   : > { %v1009_v24 = vmul.f32 %v3007_v22, %v2999_v0  ;;  %v2563_v22 = vld [vmem:[%s3714_s10] ss:$0 sm:$0xff] }
 0x46f   : > { %v1010_v28 = vpack.c.bf16 %v1009_v24, %v1009_v24 }
 0x472   : > { %2759 = vmatmul.mubr.msk.bf16.vlgmr.msra.gmra.mrb[4].mxu1 %vm731_vm3, %v900_v21  ;;  %v2969_v21 = vld [vmem:[%s3715_s11 + $0x8] sm:$0xff]  }
 0x473   : > { %2770 = vmatprep.mubr.msk.bf16.mxu1 %vm3101_vm0, %v3100_v1 }
 0x48e   : > { %v1117_v23 = vpop.xlane.xlu1 %1116 }
 0x48f   : > { %3008 = vrcp.f32 %v1117_v23 }
 0x492   : > { %v1012_v25 = vpop.permute.xlu1 %1011 }
 0x493   : > { %v1017_v26 = vsel %vm795_vm4, %v1012_v25, 0 }
 0x494   : > { %2769 = vmatpush3.bf16.msra.mxu1 %v1017_v26 }
 0x495   : > { %2780 = vmatprep.subr.bf16.mxu1 %v3100_v1 }
 0x497   : > { %2771 = vmatmul.mubr.msk.bf16.vlgmr.msra.gmra.mrb[8].mxu1 %vm731_vm3, %v1010_v28 }
 0x498   : > { %2781 = vmatpush3.bf16.msra.mxu1 %v1127_v29  ;;  %2782 = vmatprep.mubr.msk.bf16.mxu1 %vm3101_vm0, %v3100_v1 }
 0x499   : > { %v3009_v30 = vpop.eup %3008  ;;  %2794 = vmatprep.subr.bf16.mxu1 %v3100_v1 }
 0x49a   : > { %v1119_v31 = vmul.f32 %v3009_v30, %v3001_v6  ;;  %v2567_v30 = vld [vmem:[%s3716_s12] ss:$0 sm:$0xff] }
 0x49c   : > { %v1120_v32 = vpack.c.bf16 %v1119_v31, %v1119_v31 }
 0x49f   : > { %2783 = vmatmul.mubr.msk.bf16.vlgmr.msra.gmra.mrb[12].mxu1 %vm731_vm3, %v1120_v32 }
 0x4a0   : > { %2798 = vmatprep.mubr.msk.bf16.mxu1 %vm3101_vm0, %v3100_v1  ;;  %2795 = vmatpush3.bf16.msra.mxu1 %v2966_v9 }
 0x4a1   : > { %2796 = vmatprep.subr.bf16.mxu1 %v3100_v1 }
 0x53d   : > { %v833_v33 = vpop.f32.mrb[0].mxu1 }
 0x53e   : > { %v2748_v34 = vpop.f32.mrb[1].mxu1 }
 0x53f   : > { %v836_v35 = vpop.f32.mrb[2].mxu1 }
 0x540   : > { %v2749_v36 = vpop.f32.mrb[3].mxu1 }
 0x545   : > { %v943_v37 = vpop.f32.mrb[4].mxu1 }
 0x546   : > { %1170 = vrot.lane.b32.xlu1 %v943_v37, %s3740_s29  ;;  %v2760_v38 = vpop.f32.mrb[5].mxu1  ;;  %s3763_s29 = smov 72  }
 0x547   : > { %v946_v39 = vpop.f32.mrb[6].mxu1 }
 0x548   : > { %v2761_v40 = vpop.f32.mrb[7].mxu1 }
 0x56a   : > { %v1053_v43 = vpop.f32.mrb[8].mxu1 }
 0x56b   : > { %1174 = vrot.lane.b32.xlu0 %v1053_v43, %s3739_s24  ;;  %v2772_v44 = vpop.f32.mrb[9].mxu1  ;;  %v2970_v43 = vld [vmem:[%s3755_s28 + $0x10] sm:$0xff]   ;;  %s3762_s24 = smov 80  }
 0x56c   : > { %v1056_v45 = vpop.f32.mrb[10].mxu1  ;;  %v2971_v44 = vld [vmem:[%s3755_s28 + $0x18] sm:$0xff]  }
 0x56d   : > { %v2773_v46 = vpop.f32.mrb[11].mxu1 }
 0x572   : > { %v1163_v47 = vpop.f32.mrb[12].mxu1 }
 0x573   : > { %1178 = vrot.lane.b32.xlu1 %v1163_v47, %s3738_s25  ;;  %v2784_v48 = vpop.f32.mrb[13].mxu1  ;;  %s3760_s25 = smov 120  }
 0x574   : > { %v1166_v49 = vpop.f32.mrb[14].mxu1 }
 0x575   : > { %v2785_v50 = vpop.f32.mrb[15].mxu1  ;;  %v2571_v49 = vld [vmem:[%s3717_s13] ss:$0 sm:$0xff] }
 0x5b8   : > { %v1171_v51 = vpop.permute.xlu1 %1170 }
 0x5b9   : > { %v1181_v53 = vsel %vm731_vm3, %v833_v33, %v1171_v51  ;;  %v2572_v51 = vld [vmem:[%s3718_s14] ss:$0 sm:$0xff] }
 0x5dd   : > { %v1175_v52 = vpop.permute.xlu0 %1174 }
 0x5de   : > { %v1182_v54 = vsel %vm615_vm1, %v1181_v53, %v1175_v52 }
 0x5e5   : > { %v1179_v55 = vpop.permute.xlu1 %1178 }
 0x5e6   : > { %v1184_v56 = vsel %vm1183_vm5, %v1182_v54, %v1179_v55  ;;  %v2578_v55 = vld [vmem:[%s3758_s4 + $0x1] ss:$0 sm:$0xff] }
 0x5e7   : > { %v1189_v57 = vpack.c.bf16 %v1184_v56, %v1184_v56 }
 0x5e9   : > { %2791 = vmatmul.mubr.msk.bf16.vlgmr.msra.gmra.mrb[24].mxu0 %vm683_vm2, %v1189_v57 }
 0x5ea   : > { %2806 = vmatprep.mubr.msk.bf16.mxu0 %vm3101_vm0, %v3100_v1  ;;  %2803 = vmatpush3.bf16.msra.mxu0 %v2968_v18 }
 0x5eb   : > { %2804 = vmatprep.subr.bf16.mxu0 %v3100_v1 }
 0x5ee   : > { %2805 = vmatpush3.bf16.msra.mxu0 %v2969_v21 }
 0x5ef   : > { %2818 = vmatprep.subr.bf16.mxu0 %v3100_v1 }
 0x6bc   : > { %v1246_v59 = vpop.f32.mrb[24].mxu0 }
 0x6bd   : > { %v1247_v60 = vadd.f32 %v2557_v58, %v1246_v59  ;;  %v2792_v61 = vpop.f32.mrb[25].mxu0 }
 0x6be   : > { %v1249_v62 = vpop.f32.mrb[26].mxu0 }
 0x6bf   : > { %v2793_v63 = vpop.f32.mrb[27].mxu0  ;;  %v1252_v0 = vadd.f32 %v1247_v60, %v3295_v8  ;;  %v2967_v8 = vld [vmem:[%s3713_s9 + $0x8] sm:$0xff]  }
 0x6c0   : > { %2797 = vmatpush3.bf16.msra.mxu1 %v2967_v8 }
 0x6c1   : > { %v1255_v2 = vsel %vm683_vm2, %v1252_v0, 0.0  ;;  %2810 = vmatprep.subr.bf16.mxu1 %v3100_v1 }
 0x6c2   : > { %1256 = vadd.xlane.f32.xlu0 %v1255_v2 }
 0x74f   : > { %v1257_v3 = vpop.xlane.xlu0 %1256 }
 0x750   : > { %v1259_v4 = vmul.f32 0.03125, %v1257_v3 }
 0x752   : > { %v1260_v5 = vsub.f32 %v1252_v0, %v1259_v4 }
 0x754   : > { %v1261_v6 = vmul.f32 %v1260_v5, %v1260_v5 }
 0x756   : > { %v1262_v7 = vsel %vm683_vm2, %v1261_v6, 0.0 }
 0x757   : > { %1263 = vadd.xlane.f32.xlu1 %v1262_v7 }
 0x7e4   : > { %v1264_v10 = vpop.xlane.xlu1 %1263 }
 0x7e5   : > { %v1265_v11 = vmul.f32 0.03125, %v1264_v10 }
 0x7e7   : > { %v1266_v12 = vadd.f32 1e-05, %v1265_v11 }
 0x7e9   : > { %3010 = vrsqrt.f32 %v1266_v12 }
 0x7f3   : > { %v3011_v13 = vpop.eup %3010 }
 0x7f4   : > { %v1268_v15 = vmul.f32 %v3011_v13, %v1260_v5 }
 0x7f6   : > { %v1275_v17 = vmul.f32 %v2561_v14, %v1268_v15 }
 0x7f8   : > { %v1282_v19 = vadd.f32 %v2562_v16, %v1275_v17 }
 0x7fa   : > { %v1287_v20 = vpack.c.bf16 %v1282_v19, %v1282_v19 }
 0x7fc   : > { %2799 = vmatmul.mubr.msk.bf16.vlgmr.msra.gmra.mrb[16].mxu1 %vm683_vm2, %v1287_v20 }
 0x7fd   : > { %2814 = vmatprep.mubr.msk.bf16.mxu1 %vm3101_vm0, %v3100_v1  ;;  %2811 = vmatpush3.bf16.msra.mxu1 %v2970_v43 }
 0x7fe   : > { %2812 = vmatprep.subr.bf16.mxu1 %v3100_v1 }
 0x801   : > { %2813 = vmatpush3.bf16.msra.mxu1 %v2971_v44 }
 0x802   : > { %2824 = vmatprep.subr.bf16.mxu1 %v3100_v1 }
 0x8cf   : > { %v1344_v23 = vpop.f32.mrb[16].mxu1 }
 0x8d0   : > { %v1345_v24 = vadd.f32 %v2563_v22, %v1344_v23  ;;  %v2800_v25 = vpop.f32.mrb[17].mxu1 }
 0x8d1   : > { %v1347_v26 = vpop.f32.mrb[18].mxu1 }
 0x8d2   : > { %v1350_v27 = vmax.f32 %v1345_v24, 0.0  ;;  %v2801_v28 = vpop.f32.mrb[19].mxu1 }
 0x8d4   : > { %v1355_v29 = vpack.c.bf16 %v1350_v27, %v1350_v27 }
 0x8d6   : > { %2807 = vmatmul.mubr.msk.bf16.vlgmr.msra.gmra.mrb[28].mxu0 %vm683_vm2, %v1355_v29 }
 0x8d7   : > { %2820 = vmatprep.mubr.msk.bf16.mxu0 %vm3101_vm0, %v3100_v1 }
 0x9a9   : > { %v1412_v31 = vpop.f32.mrb[28].mxu0 }
 0x9aa   : > { %v1413_v32 = vadd.f32 %v2567_v30, %v1412_v31  ;;  %v2808_v33 = vpop.f32.mrb[29].mxu0 }
 0x9ab   : > { %v1415_v34 = vpop.f32.mrb[30].mxu0 }
 0x9ac   : > { %v2809_v35 = vpop.f32.mrb[31].mxu0  ;;  %v1418_v36 = vadd.f32 %v1413_v32, %v1282_v19 }
 0x9ae   : > { %v1421_v37 = vsel %vm683_vm2, %v1418_v36, 0.0 }
 0x9af   : > { %1422 = vadd.xlane.f32.xlu0 %v1421_v37 }
 0xa3c   : > { %v1423_v38 = vpop.xlane.xlu0 %1422 }
 0xa3d   : > { %v1424_v39 = vmul.f32 0.03125, %v1423_v38 }
 0xa3f   : > { %v1425_v40 = vsub.f32 %v1418_v36, %v1424_v39 }
 0xa41   : > { %v1426_v41 = vmul.f32 %v1425_v40, %v1425_v40 }
 0xa43   : > { %v1427_v42 = vsel %vm683_vm2, %v1426_v41, 0.0 }
 0xa44   : > { %1428 = vadd.xlane.f32.xlu0 %v1427_v42 }
 0xad1   : > { %v1429_v45 = vpop.xlane.xlu0 %1428 }
 0xad2   : > { %v1430_v46 = vmul.f32 0.03125, %v1429_v45 }
 0xad4   : > { %v1431_v47 = vadd.f32 1e-05, %v1430_v46 }
 0xad6   : > { %3012 = vrsqrt.f32 %v1431_v47 }
 0xae0   : > { %v3013_v48 = vpop.eup %3012 }
 0xae1   : > { %v1433_v50 = vmul.f32 %v3013_v48, %v1425_v40 }
 0xae3   : > { %v1440_v52 = vmul.f32 %v2571_v49, %v1433_v50 }
 0xae5   : > { %v3451_v53 = vadd.f32 %v2572_v51, %v1440_v52 }
 0xae7   : > { %v1453_v54 = vpack.c.bf16 %v3451_v53, %v3451_v53 }
 0xae9   : > { %2815 = vmatmul.mubr.msk.bf16.vlgmr.msra.gmra.mrb[20].mxu1 %vm683_vm2, %v1453_v54 }
 0xaea   : > { %2826 = vmatprep.mubr.msk.bf16.mxu1 %vm3101_vm0, %v3100_v1 }
 0xbbc   : > { %v1511_v56 = vpop.f32.mrb[20].mxu1 }
 0xbbd   : > { %v1512_v57 = vadd.f32 %v2578_v55, %v1511_v56  ;;  %v2816_v58 = vpop.f32.mrb[21].mxu1 }
 0xbbe   : > { %v1514_v59 = vpop.f32.mrb[22].mxu1 }
 0xbbf   : > { %v3461_v60 = vpack.c.bf16 %v1512_v57, %v1512_v57  ;;  %v2817_v61 = vpop.f32.mrb[23].mxu1 }
 0xbc1   : > { %1629 = vrot.lane.b32.xlu0 %v3461_v60, %s3105_s22  ;;  %1519 = vrot.lane.b32.xlu1 %v3461_v60, %s3741_s27  ;;  %s3764_s22 = smov 56   ;;  %s3116_s27 = smov 32  }
 0xbc5   : > { %1737 = vrot.lane.b32.xlu0 %v3461_v60, %s3107_s20  ;;  %1627 = vrot.lane.b32.xlu1 %v3461_v60, %s3760_s25  ;;  %s3765_s20 = smov 64   ;;  %s3768_s25 = smov 8  }
 0xbc9   : > { %1847 = vrot.lane.b32.xlu0 %v3461_v60, %s3761_s26  ;;  %1739 = vrot.lane.b32.xlu1 %v3461_v60, %s3762_s24  ;;  %s2641_s26 = sshll.u32 %s3239_s1, 4  ;;  %s3117_s1 = smov [#allocation2]  }
 0xbca   : > { %s3661_s4 = scalar_lea.hbm %s3723_s19, %s2641_s26 }
 0xbcd   : > { %1849 = vrot.lane.b32.xlu1 %v3461_v60, %s3763_s29  ;;  %s3771_s29 = smov 96  }
 0xc33   : > { %v1520_v62 = vpop.permute.xlu1 %1519  ;;  %v1630_v0 = vpop.permute.xlu0 %1629 }
 0xc34   : > { %v1525_v63 = vsel %vm731_vm3, %v1520_v62, 0  ;;  %v1635_v3 = vsel %vm731_vm3, %v1630_v0, 0 }
 0xc35   : > { %2819 = vmatpush3.bf16.xpose.msra.mxu0 %v1525_v63 }
 0xc36   : > { %2830 = vmatprep.subr.bf16.mxu0 %v3100_v1 }
 0xc37   : > { %v1628_v2 = vpop.permute.xlu1 %1627  ;;  %v1738_v7 = vpop.permute.xlu0 %1737 }
 0xc3b   : > { %v1740_v4 = vpop.permute.xlu1 %1739  ;;  %v1848_v8 = vpop.permute.xlu0 %1847 }
 0xc3c   : > { %2821 = vmatmul.mubr.msk.bf16.vlgmr.msra.gmra.mrb[32].mxu0 %vm731_vm3, %v3461_v60  ;;  %v1745_v5 = vsel %vm731_vm3, %v1740_v4, 0 }
 0xc3d   : > { %2831 = vmatpush3.bf16.xpose.msra.mxu0 %v1635_v3  ;;  %2832 = vmatprep.mubr.msk.bf16.mxu0 %vm3101_vm0, %v3100_v1 }
 0xc3e   : > { %2842 = vmatprep.subr.bf16.mxu0 %v3100_v1 }
 0xc3f   : > { %v1850_v6 = vpop.permute.xlu1 %1849 }
 0xc40   : > { %v1855_v9 = vsel %vm731_vm3, %v1850_v6, 0 }
 0xc44   : > { %2833 = vmatmul.mubr.msk.bf16.vlgmr.msra.gmra.mrb[36].mxu0 %vm731_vm3, %v1628_v2 }
 0xc45   : > { %2843 = vmatpush3.bf16.xpose.msra.mxu0 %v1745_v5  ;;  %2844 = vmatprep.mubr.msk.bf16.mxu0 %vm3101_vm0, %v3100_v1 }
 0xc46   : > { %2854 = vmatprep.subr.bf16.mxu0 %v3100_v1 }
 0xc4c   : > { %2845 = vmatmul.mubr.msk.bf16.vlgmr.msra.gmra.mrb[40].mxu0 %vm731_vm3, %v1738_v7 }
 0xc4d   : > { %2855 = vmatpush3.bf16.xpose.msra.mxu0 %v1855_v9  ;;  %2856 = vmatprep.mubr.msk.bf16.mxu0 %vm3101_vm0, %v3100_v1 }
 0xc4e   : > { %2866 = vmatprep.subr.bf16.mxu0 %v3100_v1 }
 0xc54   : > { %2857 = vmatmul.mubr.msk.bf16.vlgmr.msra.gmra.mrb[44].mxu0 %vm731_vm3, %v1848_v8 }
 0xc55   : > { %2870 = vmatprep.mubr.msk.bf16.mxu0 %vm3101_vm0, %v3100_v1 }
 0xd0f   : > { %v1561_v10 = vpop.f32.mrb[32].mxu0 }
 0xd10   : > { %v2822_v11 = vpop.f32.mrb[33].mxu0  ;;  %v1567_v12 = vsel %vm731_vm3, %v1561_v10, -inf }
 0xd11   : > { %1568 = vmax.xlane.f32.xlu1 %v1567_v12  ;;  %v1564_v13 = vpop.f32.mrb[34].mxu0 }
 0xd12   : > { %v2823_v14 = vpop.f32.mrb[35].mxu0 }
 0xd17   : > { %v1671_v15 = vpop.f32.mrb[36].mxu0 }
 0xd18   : > { %v2834_v16 = vpop.f32.mrb[37].mxu0  ;;  %v1677_v17 = vsel %vm731_vm3, %v1671_v15, -inf }
 0xd19   : > { %1678 = vmax.xlane.f32.xlu0 %v1677_v17  ;;  %v1674_v19 = vpop.f32.mrb[38].mxu0 }
 0xd1a   : > { %v2835_v20 = vpop.f32.mrb[39].mxu0 }
 0xd1f   : > { %v1781_v18 = vpop.f32.mrb[40].mxu0 }
 0xd20   : > { %v2846_v21 = vpop.f32.mrb[41].mxu0  ;;  %v1787_v22 = vsel %vm731_vm3, %v1781_v18, -inf }
 0xd21   : > { %1788 = vmax.xlane.f32.xlu0 %v1787_v22  ;;  %v1784_v23 = vpop.f32.mrb[42].mxu0  ;;  %v2973_v21 = vld [vmem:[%s3759_s5 + $0x18] sm:$0xff]  }
 0xd22   : > { %v2847_v24 = vpop.f32.mrb[43].mxu0 }
 0xd27   : > { %v1891_v25 = vpop.f32.mrb[44].mxu0 }
 0xd28   : > { %v2858_v26 = vpop.f32.mrb[45].mxu0  ;;  %v1897_v27 = vsel %vm731_vm3, %v1891_v25, -inf }
 0xd29   : > { %1898 = vmax.xlane.f32.xlu1 %v1897_v27  ;;  %v1894_v28 = vpop.f32.mrb[46].mxu0 }
 0xd2a   : > { %v2859_v29 = vpop.f32.mrb[47].mxu0 }
 0xd9e   : > { %v1569_v30 = vpop.xlane.xlu1 %1568 }
 0xd9f   : > { %v1570_v31 = vsub.f32 %v1561_v10, %v1569_v30 }
 0xda1   : > { %v1571_v32 = vmul.f32 1.442695, %v1570_v31 }
 0xda3   : > { %3014 = vpow2.f32 %v1571_v32 }
 0xda6   : > { %v1679_v33 = vpop.xlane.xlu0 %1678 }
 0xda7   : > { %v1680_v34 = vsub.f32 %v1671_v15, %v1679_v33 }
 0xda9   : > { %v1681_v35 = vmul.f32 1.442695, %v1680_v34 }
 0xdab   : > { %3016 = vpow2.f32 %v1681_v35 }
 0xdad   : > { %v3015_v36 = vpop.eup %3014 }
 0xdae   : > { %v1789_v37 = vpop.xlane.xlu0 %1788  ;;  %v1573_v38 = vsel %vm731_vm3, %v3015_v36, 0.0 }
 0xdaf   : > { %v1790_v39 = vsub.f32 %v1781_v18, %v1789_v37  ;;  %1574 = vadd.xlane.f32.xlu0 %v1573_v38  ;;  %v2972_v18 = vld [vmem:[%s3759_s5 + $0x10] sm:$0xff]   ;;  %v2595_v37 = vld [vmem:[%s3710_s6 + $0x1] ss:$0 sm:$0xff]  ;;  %s591_s5 = sand.u32 1, %s3090_s30  }
 0xdb0   : > { %2867 = vmatpush3.bf16.msra.mxu0 %v2972_v18  ;;  %s592_s24 = scalar_lea.vmem [#allocation2], %s591_s5 }
 0xdb1   : > { %v1791_v40 = vmul.f32 1.442695, %v1790_v39  ;;  %2868 = vmatprep.subr.bf16.mxu0 %v3100_v1 }
 0xdb3   : > { %3018 = vpow2.f32 %v1791_v40 }
 0xdb4   : > { %2869 = vmatpush3.bf16.msra.mxu0 %v2973_v21  ;;  %v2978_v21 = vld [vmem:[%s3719_s15 + $0x40] sm:$0xff]  }
 0xdb5   : > { %v3017_v41 = vpop.eup %3016  ;;  %2882 = vmatprep.subr.bf16.mxu0 %v3100_v1 }
 0xdb6   : > { %v1683_v42 = vsel %vm731_vm3, %v3017_v41, 0.0  ;;  %v1899_v45 = vpop.xlane.xlu1 %1898 }
 0xdb7   : > { %1684 = vadd.xlane.f32.xlu1 %v1683_v42  ;;  %v1900_v46 = vsub.f32 %v1891_v25, %v1899_v45 }
 0xdb9   : > { %v1901_v47 = vmul.f32 1.442695, %v1900_v46 }
 0xdbb   : > { %3020 = vpow2.f32 %v1901_v47 }
 0xdbd   : > { %v3019_v43 = vpop.eup %3018 }
 0xdbe   : > { %v1793_v44 = vsel %vm731_vm3, %v3019_v43, 0.0 }
 0xdbf   : > { %1794 = vadd.xlane.f32.xlu0 %v1793_v44 }
 0xdc5   : > { %v3021_v48 = vpop.eup %3020 }
 0xdc6   : > { %v1903_v49 = vsel %vm731_vm3, %v3021_v48, 0.0 }
 0xdc8   : > { %1689 = vrot.lane.b32.xlu1 %v3461_v60, %s3764_s22  ;;  %s2470_s22 = scalar_lea.sflag [#allocation3], %s591_s5 }
 0xdd5   : > { %1579 = vrot.lane.b32.xlu0 %v3461_v60, %s3765_s20 }
 0xdd9   : > { %1909 = vrot.lane.b32.xlu0 %v3461_v60, %s3766_s23  ;;  %s3769_s23 = smov 16  }
 0xdec   : > { %1904 = vadd.xlane.f32.xlu1 %v1903_v49 }
 0xdfd   : > { %1799 = vrot.lane.b32.xlu1 %v3461_v60, %s3767_s2  ;;  %s3770_s2 = smov 24  }
 0xe3c   : > { %v1575_v50 = vpop.xlane.xlu0 %1574 }
 0xe3d   : > { %3022 = vrcp.f32 %v1575_v50  ;;  %v2974_v50 = vld [vmem:[%s3713_s9 + $0x10] sm:$0xff]  }
 0xe44   : > { %v1685_v51 = vpop.xlane.xlu1 %1684 }
 0xe45   : > { %3024 = vrcp.f32 %v1685_v51 }
 0xe47   : > { %v3023_v52 = vpop.eup %3022 }
 0xe48   : > { %v1577_v55 = vmul.f32 %v3023_v52, %v3015_v36  ;;  %v1690_v58 = vpop.permute.xlu1 %1689 }
 0xe49   : > { %v1695_v62 = vsel %vm795_vm4, %v1690_v58, 0  ;;  %v2602_v58 = vld [vmem:[%s3712_s8 + $0x1] ss:$0 sm:$0xff] }
 0xe4a   : > { %v1578_v59 = vpack.c.bf16 %v1577_v55, %v1577_v55 }
 0xe4c   : > { %v1795_v54 = vpop.xlane.xlu0 %1794 }
 0xe4d   : > { %3026 = vrcp.f32 %v1795_v54 }
 0xe4f   : > { %v3025_v61 = vpop.eup %3024 }
 0xe50   : > { %v1580_v56 = vpop.permute.xlu0 %1579  ;;  %v1687_v60 = vmul.f32 %v3025_v61, %v3017_v41 }
 0xe51   : > { %v1585_v57 = vsel %vm795_vm4, %v1580_v56, 0  ;;  %v2601_v56 = vld [vmem:[%s3711_s7 + $0x1] ss:$0 sm:$0xff] }
 0xe52   : > { %2825 = vmatpush3.bf16.msra.mxu1 %v1585_v57  ;;  %v1688_v63 = vpack.c.bf16 %v1687_v60, %v1687_v60  ;;  %v2976_v60 = vld [vmem:[%s3715_s11 + $0x10] sm:$0xff]  }
 0xe53   : > { %2836 = vmatprep.subr.bf16.mxu1 %v3100_v1 }
 0xe54   : > { %v1910_v6 = vpop.permute.xlu0 %1909 }
 0xe55   : > { %2827 = vmatmul.mubr.msk.bf16.vlgmr.msra.gmra.mrb[24].mxu1 %vm731_vm3, %v1578_v59  ;;  %v1915_v9 = vsel %vm795_vm4, %v1910_v6, 0 }
 0xe56   : > { %2837 = vmatpush3.bf16.msra.mxu1 %v1695_v62  ;;  %2838 = vmatprep.mubr.msk.bf16.mxu1 %vm3101_vm0, %v3100_v1 }
 0xe57   : > { %2848 = vmatprep.subr.bf16.mxu1 %v3100_v1  ;;  %v3027_v0 = vpop.eup %3026 }
 0xe58   : > { %v1797_v3 = vmul.f32 %v3027_v0, %v3019_v43  ;;  %v2608_v0 = vld [vmem:[%s3714_s10 + $0x1] ss:$0 sm:$0xff] }
 0xe5a   : > { %v1798_v7 = vpack.c.bf16 %v1797_v3, %v1797_v3 }
 0xe5d   : > { %2839 = vmatmul.mubr.msk.bf16.vlgmr.msra.gmra.mrb[28].mxu1 %vm731_vm3, %v1688_v63  ;;  %v2977_v63 = vld [vmem:[%s3715_s11 + $0x18] sm:$0xff]  }
 0xe5e   : > { %2850 = vmatprep.mubr.msk.bf16.mxu1 %vm3101_vm0, %v3100_v1 }
 0xe79   : > { %v1905_v2 = vpop.xlane.xlu1 %1904 }
 0xe7a   : > { %3028 = vrcp.f32 %v1905_v2 }
 0xe7d   : > { %v1800_v4 = vpop.permute.xlu1 %1799 }
 0xe7e   : > { %v1805_v5 = vsel %vm795_vm4, %v1800_v4, 0 }
 0xe7f   : > { %2849 = vmatpush3.bf16.msra.mxu1 %v1805_v5 }
 0xe80   : > { %2860 = vmatprep.subr.bf16.mxu1 %v3100_v1 }
 0xe82   : > { %2851 = vmatmul.mubr.msk.bf16.vlgmr.msra.gmra.mrb[32].mxu1 %vm731_vm3, %v1798_v7 }
 0xe83   : > { %2861 = vmatpush3.bf16.msra.mxu1 %v1915_v9  ;;  %2862 = vmatprep.mubr.msk.bf16.mxu1 %vm3101_vm0, %v3100_v1 }
 0xe84   : > { %v3029_v8 = vpop.eup %3028  ;;  %2874 = vmatprep.subr.bf16.mxu1 %v3100_v1 }
 0xe85   : > { %v1907_v10 = vmul.f32 %v3029_v8, %v3021_v48 }
 0xe87   : > { %v1908_v11 = vpack.c.bf16 %v1907_v10, %v1907_v10 }
 0xe8a   : > { %2863 = vmatmul.mubr.msk.bf16.vlgmr.msra.gmra.mrb[36].mxu1 %vm731_vm3, %v1908_v11 }
 0xe8b   : > { %2878 = vmatprep.mubr.msk.bf16.mxu1 %vm3101_vm0, %v3100_v1  ;;  %2875 = vmatpush3.bf16.msra.mxu1 %v2974_v50 }
 0xe8c   : > { %2876 = vmatprep.subr.bf16.mxu1 %v3100_v1 }
 0xf28   : > { %v1621_v12 = vpop.f32.mrb[24].mxu1 }
 0xf29   : > { %v2828_v13 = vpop.f32.mrb[25].mxu1 }
 0xf2a   : > { %v1624_v14 = vpop.f32.mrb[26].mxu1 }
 0xf2b   : > { %v2829_v15 = vpop.f32.mrb[27].mxu1 }
 0xf30   : > { %v1731_v16 = vpop.f32.mrb[28].mxu1 }
 0xf31   : > { %1958 = vrot.lane.b32.xlu1 %v1731_v16, %s3768_s25  ;;  %v2840_v17 = vpop.f32.mrb[29].mxu1 }
 0xf32   : > { %v1734_v19 = vpop.f32.mrb[30].mxu1 }
 0xf33   : > { %v2841_v20 = vpop.f32.mrb[31].mxu1 }
 0xf55   : > { %v1841_v22 = vpop.f32.mrb[32].mxu1 }
 0xf56   : > { %1962 = vrot.lane.b32.xlu0 %v1841_v22, %s3769_s23  ;;  %v2852_v23 = vpop.f32.mrb[33].mxu1  ;;  %v2979_v22 = vld [vmem:[%s3719_s15] sm:$0xff]  }
 0xf57   : > { %v1844_v24 = vpop.f32.mrb[34].mxu1  ;;  %v2980_v23 = vld [vmem:[%s3719_s15 + $0x48] sm:$0xff]  }
 0xf58   : > { %v2853_v25 = vpop.f32.mrb[35].mxu1  ;;  %v2981_v24 = vld [vmem:[%s3719_s15 + $0x8] sm:$0xff]  }
 0xf59   : > { %v2982_v25 = vld [vmem:[%s3719_s15 + $0x50] sm:$0xff]  }
 0xf5d   : > { %v1951_v26 = vpop.f32.mrb[36].mxu1 }
 0xf5e   : > { %1966 = vrot.lane.b32.xlu1 %v1951_v26, %s3770_s2  ;;  %v2864_v27 = vpop.f32.mrb[37].mxu1  ;;  %v2983_v26 = vld [vmem:[%s3719_s15 + $0x10] sm:$0xff]   ;;  %s3040_s2 = sshll.u32 %s3117_s1, 4  ;;  %s3041_s2 = int_to_ptr.vmem [resolvable:$false] %s3040_s2 }
 0xf5f   : > { %v1954_v28 = vpop.f32.mrb[38].mxu1  ;;  %v2984_v27 = vld [vmem:[%s3719_s15 + $0x58] sm:$0xff]   ;;  %s3042_s25 = scalar_lea.vmem %s3041_s2, 32 }
 0xf60   : > { %v2865_v29 = vpop.f32.mrb[39].mxu1  ;;  %v2985_v28 = vld [vmem:[%s3719_s15 + $0x18] sm:$0xff]  }
 0xf61   : > { %v2986_v29 = vld [vmem:[%s3719_s15 + $0x60] sm:$0xff]  }
 0xfa3   : > { %v1959_v30 = vpop.permute.xlu1 %1958 }
 0xfa4   : > { %v1969_v32 = vsel %vm731_vm3, %v1621_v12, %v1959_v30  ;;  %v2987_v30 = vld [vmem:[%s3719_s15 + $0x20] sm:$0xff]  }
 0xfc8   : > { %v1963_v31 = vpop.permute.xlu0 %1962 }
 0xfc9   : > { %v1970_v33 = vsel %vm615_vm1, %v1969_v32, %v1963_v31  ;;  %v2988_v31 = vld [vmem:[%s3719_s15 + $0x68] sm:$0xff]  }
 0xfca   : > { %v2989_v32 = vld [vmem:[%s3719_s15 + $0x28] sm:$0xff]  }
 0xfd0   : > { %v1967_v34 = vpop.permute.xlu1 %1966 }
 0xfd1   : > { %v1971_v35 = vsel %vm1183_vm5, %v1970_v33, %v1967_v34 }
 0xfd2   : > { %v1977_v36 = vpack.c.bf16 %v1971_v35, %v1971_v35 }
 0xfd4   : > { %2871 = vmatmul.mubr.msk.bf16.vlgmr.msra.gmra.mrb[48].mxu0 %vm683_vm2, %v1977_v36  ;;  %v2990_v36 = vld [vmem:[%s3719_s15 + $0x70] sm:$0xff]  }
 0xfd5   : > { %2886 = vmatprep.mubr.msk.bf16.mxu0 %vm3101_vm0, %v3100_v1  ;;  %2883 = vmatpush3.bf16.msra.mxu0 %v2976_v60 }
 0xfd6   : > { %2884 = vmatprep.subr.bf16.mxu0 %v3100_v1  ;;  %v2617_v1 = vld [vmem:[%s3716_s12 + $0x1] ss:$0 sm:$0xff] }
 0xfd9   : > { %2885 = vmatpush3.bf16.msra.mxu0 %v2977_v63 }
0x10a7   : > { %v2035_v38 = vpop.f32.mrb[48].mxu0 }
0x10a8   : > { %v2036_v39 = vadd.f32 %v2595_v37, %v2035_v38  ;;  %v2872_v40 = vpop.f32.mrb[49].mxu0  ;;  %v2623_v38 = vld [vmem:[%s3717_s13 + $0x1] ss:$0 sm:$0xff] }
0x10a9   : > { %v2038_v41 = vpop.f32.mrb[50].mxu0 }
0x10aa   : > { %v2873_v42 = vpop.f32.mrb[51].mxu0  ;;  %v2041_v43 = vadd.f32 %v2036_v39, %v3451_v53  ;;  %v2975_v53 = vld [vmem:[%s3713_s9 + $0x18] sm:$0xff]   ;;  %v2991_v39 = vld [vmem:[%s3719_s15 + $0x30] sm:$0xff]   ;;  %v2624_v41 = vld [vmem:[%s3718_s14 + $0x1] ss:$0 sm:$0xff] }
0x10ab   : > { %2877 = vmatpush3.bf16.msra.mxu1 %v2975_v53 }
0x10ac   : > { %v2046_v44 = vsel %vm683_vm2, %v2041_v43, 0.0  ;;  %2702 = vmatprep.subr.bf16.mxu1 %v2978_v21 }
0x10ad   : > { %2047 = vadd.xlane.f32.xlu0 %v2046_v44  ;;  %v2993_v44 = vld [vmem:[%s3719_s15 + $0x38] sm:$0xff]  }
0x113a   : > { %v2048_v45 = vpop.xlane.xlu0 %2047 }
0x113b   : > { %v2049_v46 = vmul.f32 0.03125, %v2048_v45 }
0x113d   : > { %v2050_v47 = vsub.f32 %v2041_v43, %v2049_v46  ;;  %v2992_v43 = vld [vmem:[%s3719_s15 + $0x78] sm:$0xff]  }
0x113f   : > { %v2051_v48 = vmul.f32 %v2050_v47, %v2050_v47 }
0x1141   : > { %v2052_v49 = vsel %vm683_vm2, %v2051_v48, 0.0 }
0x1142   : > { %2053 = vadd.xlane.f32.xlu1 %v2052_v49 }
0x11cf   : > { %v2054_v51 = vpop.xlane.xlu1 %2053 }
0x11d0   : > { %v2055_v52 = vmul.f32 0.03125, %v2054_v51 }
0x11d2   : > { %v2056_v54 = vadd.f32 1e-05, %v2055_v52 }
0x11d4   : > { %3030 = vrsqrt.f32 %v2056_v54 }
0x11de   : > { %v3031_v55 = vpop.eup %3030 }
0x11df   : > { %v2058_v57 = vmul.f32 %v3031_v55, %v2050_v47 }
0x11e1   : > { %v2065_v59 = vmul.f32 %v2601_v56, %v2058_v57 }
0x11e3   : > { %v2072_v61 = vadd.f32 %v2602_v58, %v2065_v59 }
0x11e5   : > { %v2078_v62 = vpack.c.bf16 %v2072_v61, %v2072_v61 }
0x11e7   : > { %2879 = vmatmul.mubr.msk.bf16.vlgmr.msra.gmra.mrb[40].mxu1 %vm683_vm2, %v2078_v62 }
0x11e8   : > { %2703 = vmatpush3.bf16.msra.mxu1 %v2979_v22 }
0x11e9   : > { %2704 = vmatprep.subr.bf16.mxu1 %v2980_v23 }
0x11ec   : > { %2705 = vmatpush3.bf16.msra.mxu1 %v2981_v24 }
0x11ed   : > { %2706 = vmatprep.subr.bf16.mxu1 %v2982_v25 }
0x11f0   : > { %2707 = vmatpush3.bf16.msra.mxu1 %v2983_v26  ;;  %v2450_v26 = vld [vmem:[%s3721_s17] sm:$0x1] }
0x11f1   : > { %2708 = vmatprep.subr.bf16.mxu1 %v2984_v27 }
0x11f4   : > { %2709 = vmatpush3.bf16.msra.mxu1 %v2985_v28  ;;  %v2451_v28 = vld [vmem:[%s3722_s18] sm:$0x1] }
0x11f5   : > { %2710 = vmatprep.subr.bf16.mxu1 %v2986_v29 }
0x11f8   : > { %2711 = vmatpush3.bf16.msra.mxu1 %v2987_v30 }
0x11f9   : > { %2712 = vmatprep.subr.bf16.mxu1 %v2988_v31 }
0x11fc   : > { %2713 = vmatpush3.bf16.msra.mxu1 %v2989_v32 }
0x11fd   : > { %2714 = vmatprep.subr.bf16.mxu1 %v2990_v36 }
0x1200   : > { %2715 = vmatpush3.bf16.msra.mxu1 %v2991_v39 }
0x1201   : > { %2716 = vmatprep.subr.bf16.mxu1 %v2992_v43 }
0x1204   : > { %2717 = vmatpush3.bf16.msra.mxu1 %v2993_v44 }
0x12ba   : > { %v2136_v2 = vpop.f32.mrb[40].mxu1 }
0x12bb   : > { %v2137_v3 = vadd.f32 %v2608_v0, %v2136_v2  ;;  %v2880_v4 = vpop.f32.mrb[41].mxu1 }
0x12bc   : > { %v2139_v5 = vpop.f32.mrb[42].mxu1 }
0x12bd   : > { %v2142_v6 = vmax.f32 %v2137_v3, 0.0  ;;  %v2881_v7 = vpop.f32.mrb[43].mxu1 }
0x12bf   : > { %v2148_v9 = vpack.c.bf16 %v2142_v6, %v2142_v6 }
0x12c1   : > { %2887 = vmatmul.mubr.msk.bf16.vlgmr.msra.gmra.mrb[52].mxu0 %vm683_vm2, %v2148_v9 }
0x1394   : > { %v2206_v8 = vpop.f32.mrb[52].mxu0 }
0x1395   : > { %v2207_v10 = vadd.f32 %v2617_v1, %v2206_v8  ;;  %v2888_v11 = vpop.f32.mrb[53].mxu0 }
0x1396   : > { %v2209_v12 = vpop.f32.mrb[54].mxu0  ;;  %v2313_v11 = vld [vmem:[%s3720_s16] sm:$0x1] }
0x1397   : > { %v2889_v13 = vpop.f32.mrb[55].mxu0  ;;  %v2212_v14 = vadd.f32 %v2207_v10, %v2072_v61 }
0x1399   : > { %v2217_v15 = vsel %vm683_vm2, %v2212_v14, 0.0 }
0x139a   : > { %2218 = vadd.xlane.f32.xlu0 %v2217_v15 }
0x1427   : > { %v2219_v16 = vpop.xlane.xlu0 %2218 }
0x1428   : > { %v2220_v17 = vmul.f32 0.03125, %v2219_v16 }
0x142a   : > { %v2221_v19 = vsub.f32 %v2212_v14, %v2220_v17 }
0x142c   : > { %v2222_v20 = vmul.f32 %v2221_v19, %v2221_v19 }
0x142e   : > { %v2223_v18 = vsel %vm683_vm2, %v2222_v20, 0.0 }
0x142f   : > { %2224 = vadd.xlane.f32.xlu0 %v2223_v18 }
0x14bc   : > { %v2225_v33 = vpop.xlane.xlu0 %2224 }
0x14bd   : > { %v2226_v34 = vmul.f32 0.03125, %v2225_v33 }
0x14bf   : > { %v2227_v35 = vadd.f32 1e-05, %v2226_v34 }
0x14c1   : > { %3032 = vrsqrt.f32 %v2227_v35 }
0x14cb   : > { %v3033_v37 = vpop.eup %3032 }
0x14cc   : > { %v2229_v40 = vmul.f32 %v3033_v37, %v2221_v19 }
0x14ce   : > { %v2236_v42 = vmul.f32 %v2623_v38, %v2229_v40 }
0x14d0   : > { %v2243_v45 = vadd.f32 %v2624_v41, %v2236_v42 }
0x14d2   : > { %v2249_v46 = vrot.slane %v2243_v45, 2  ;;  %v2263_v47 = vrot.slane %v2243_v45, 6  ;;  %v2245_v48 = vrot.slane %v2243_v45, 1  ;;  %v2259_v49 = vrot.slane %v2243_v45, 5 }
0x14d3   : > { %v2253_v51 = vrot.slane %v2243_v45, 3  ;;  %v2267_v52 = vrot.slane %v2243_v45, 7  ;;  %v2257_v57 = vrot.slane %v2243_v45, 4 }
0x14d4   : > { %v2951_v50 = vpack.i.bf16 %v2249_v46, %v2263_v47  ;;  %v2946_v53 = vpack.i.bf16 %v2245_v48, %v2259_v49 }
0x14d5   : > { %v2956_v54 = vpack.i.bf16 %v2253_v51, %v2267_v52 }
0x14d6   : > { %2952 = vrot.lane.b32.xlu0 %v2951_v50, %s3765_s20  ;;  %2947 = vrot.lane.b32.xlu1 %v2946_v53, %s3116_s27  ;;  %s2482_s27 = sshll.u32 %s592_s24, 4  ;;  %s3663_s27 = int_to_ptr.vmem [resolvable:$true] %s2482_s27 }
0x14d7   : > { %s3036_s23 = scalar_lea.vmem %s3663_s27, 16  ;;  %p3043_p0 = scmp.lt.s32.totalorder %s3663_s27, %s3041_s2 }
0x14d8   : > { %p3037_p11 = scmp.ne.s32.totalorder %s3663_s27, %s3036_s23  ;;  %p3044_p1 = scmp.lt.s32.totalorder %s3042_s25, %s3036_s23 }
0x14da   : > { %2957 = vrot.lane.b32.xlu1 %v2956_v54, %s3771_s29  ;;  %p3038_p12 = pnand %p3037_p11, %p3256_p5  ;;  %p3045_p2 = por %p3044_p1, %p3043_p0 }
0x14dc   : > { %p3039_p13 = pneg %p3038_p12 }
0x14de   : > { %p3046_p3 = pnand %p3045_p2, %p3039_p13 }
0x1548   : > { %v2953_v55 = vpop.permute.xlu0 %2952  ;;  %v2948_v56 = vpop.permute.xlu1 %2947 }
0x1549   : > { %v2950_v58 = vunpack.i.h.bf16 %v2948_v56  ;;  %v2949_v59 = vunpack.i.l.bf16 %v2948_v56  ;;  %v2955_v61 = vunpack.i.h.bf16 %v2953_v55  ;;  %v2954_v62 = vunpack.i.l.bf16 %v2953_v55 }
0x154b   : > { %v2271_v60 = vsel %vm683_vm2, %v2243_v45, %v2950_v58  ;;  %v2276_v63 = vsel %vm683_vm2, %v2257_v57, %v2949_v59 }
0x154c   : > { %v2958_v0 = vpop.permute.xlu1 %2957  ;;  %v2273_v4 = vsel %vm2272_vm6, %v2271_v60, %v2955_v61  ;;  %v2277_v5 = vsel %vm2272_vm6, %v2276_v63, %v2954_v62 }
0x154d   : > { %v2960_v2 = vunpack.i.h.bf16 %v2958_v0  ;;  %v2959_v3 = vunpack.i.l.bf16 %v2958_v0 }
0x154f   : > { %v2275_v6 = vsel %vm2274_vm7, %v2273_v4, %v2960_v2  ;;  %v2278_v7 = vsel %vm2274_vm7, %v2277_v5, %v2959_v3 }
0x1550   : > { %v2311_v9 = vpack.c.bf16 %v2275_v6, %v2275_v6  ;;  %v2312_v1 = vpack.c.bf16 %v2278_v7, %v2278_v7 }
0x1552   : > { %2442 = vmatprep.mubr.bf16.mxu1 %v2312_v1 }
0x1553   : > { %2443 = vmatmul.mubr.bf16.vlgmr.msra.gmra.mrb[44].mxu1 %v2311_v9 }
0x1626   : > { %v2718_v8 = vpop.f32.mrb[44].mxu1 }
0x1627   : > { %v2719_v10 = vpop.f32.mrb[45].mxu1 }
0x1628   : > { %v2720_v12 = vadd.f32 %v2719_v10, %v2718_v8  ;;  %v2721_v13 = vpop.f32.mrb[46].mxu1 }
0x1629   : > { %v2722_v14 = vpop.f32.mrb[47].mxu1 }
0x162a   : > { %v2445_v15 = vadd.f32 %v2720_v12, %v2313_v11 }
0x162c   : > { %v2453_v16 = vsel %vm2452_vm8, %v2445_v15, 0.0 }
0x162d   : > { %2454 = vadd.xlane.f32.xlu1 %v2453_v16 }
0x16ba   : > { %v2455_v17 = vpop.xlane.xlu1 %2454 }
0x16bb   : > { %v2456_v19 = vmul.f32 0.03125, %v2455_v17 }
0x16bd   : > { %v2457_v20 = vsub.f32 %v2445_v15, %v2456_v19 }
0x16bf   : > { %v2458_v18 = vmul.f32 %v2457_v20, %v2457_v20 }
0x16c1   : > { %v2459_v21 = vsel %vm2452_vm8, %v2458_v18, 0.0 }
0x16c2   : > { %2460 = vadd.xlane.f32.xlu0 %v2459_v21 }
0x174f   : > { %v2461_v22 = vpop.xlane.xlu0 %2460 }
0x1750   : > { %v2462_v23 = vmul.f32 0.03125, %v2461_v22 }
0x1752   : > { %v2463_v24 = vadd.f32 1e-05, %v2462_v23 }
0x1754   : > { %3034 = vrsqrt.f32 %v2463_v24 }
0x175e   : > { %v3035_v25 = vpop.eup %3034 }
0x175f   : > { %v2465_v27 = vmul.f32 %v3035_v25, %v2457_v20 }
0x1761   : > { %v2466_v29 = vmul.f32 %v2465_v27, %v2450_v26 }
0x1763   : > { %v2467_v30 = vadd.f32 %v2466_v29, %v2451_v28 }
0x1765   : > { %2468 = vst.msk [vmem:[%s592_s24] sm:$0x1] %vm2452_vm8, %v2467_v30 }
0x1766   : > { %3049 = shalt.err (!%p3046_p3)
}
0x1767   : > { %s3050_s5 = scalar_lea.hbm %s3661_s4, 16  ;;  %s3054_s29 = scalar_lea.hbm %s3723_s19, 32 }
0x1768   : > { %p3051_p4 = scmp.ne.s32.totalorder %s3661_s4, %s3050_s5  ;;  %p3055_p9 = scmp.lt.u32.totalorder %s3661_s4, %s3723_s19 }
0x1769   : > { %p3056_p10 = scmp.lt.u32.totalorder %s3054_s29, %s3050_s5  ;;  %p3058_p12 = scmp.lt.u32.totalorder %s3050_s5, %s3661_s4 }
0x176a   : > { %p3052_p7 = pnand %p3051_p4, %p3256_p5 }
0x176b   : > { %p3057_p11 = por %p3056_p10, %p3055_p9 }
0x176c   : > { %p3053_p8 = pneg %p3052_p7 }
0x176d   : > { %p3059_p13 = por %p3058_p12, %p3057_p11 }
0x176f   : > { %p3060_p0 = pnand %p3059_p13, %p3053_p8 }
0x1771   : > { %3063 = shalt.err (!%p3060_p0)
}
0x1772   : > { %2890 = dma.vmem_to_hbm [thread:$0]  (%p3256_p5), %s3663_s27, 16, %s3661_s4, %s2470_s22  }
0x1773 PF: > { %p2896_p1 = scmp.ge.s32.totalorder %s3098_s21, 2  ;;  %s2494_s2 = sand.u32 1, %s3086_s0  }
0x1774   : > { %s2495_s25 = scalar_lea.sflag [#allocation3], %s2494_s2 }
0x1775   : > { %p2893_p2 = pnand %p2896_p1, %p3260_p6 }
0x1777   : > { %3081 = dma.done.wait (!%p2893_p2), %s2495_s25, 16  }
0x1778   : > { %3083 = vsyncadd (!%p2893_p2), %s2495_s25, 4294967280  ;;  %s3773_s21 = sld [smem:[#allocation6_spill]]  ;;  %s3774_s5 = sld [smem:[#allocation5_spill]] }
0x1779   : > { %s3775_s20 = sld [smem:[#allocation7_spill]]  ;;  %s3776_s0 = smov %s3090_s30 }
0x177e   : > { %p29_p3 = scmp.ge.s32.totalorder %s3773_s21, 4   ;;  %s3777_s30 = smov %s3774_s5 }
0x1780   :  { %31 = sbr.rel (!%p29_p3) target bundleno = 10 (0xa), region = 143 }
0x1787   :  { %2499 = vsyncpa [#allocation3], 1 }
0x1788   :  { %2501 = vsyncpa [#allocation3 + $0x1], 1 }

</bundles_post_ra>
